<compile_context>
chip_gen: v6e
topology: v6e:2x2x1
jax: 0.10.0
libtpu: 0.0.40
codegen_flags: <defaults>
</compile_context>

<pallas_src>
import jax
import jax.numpy as jnp
from jax.experimental import pallas as pl
from jax.experimental.pallas import tpu as pltpu

_LANE = 128      # TPU lane width: keep the last dim of every block a multiple of this
_SUBLANE = 8     # f32 sublane count
_TM_MAX = 512    # batch rows per grid step (multiple of 8; multiple of 256 for v6e/v7x MXU)


def _round_up(n, m):
    return ((n + m - 1) // m) * m


def _mlp_kernel(x_ref, w1_ref, b1_ref, w2_ref, b2_ref, o_ref):
    # Fused (x @ W1 + b1) -> ReLU -> (h @ W2 + b2) on one batch tile.
    # bf16 matmuls with f32 accumulation; bias/ReLU epilogue kept in f32 (v5e has
    # no bf16 VPU), only the final store casts to the output dtype.
    h = jnp.dot(x_ref[...], w1_ref[...], preferred_element_type=jnp.float32)
    h = jnp.maximum(h + b1_ref[...], 0.0)
    out = jnp.dot(h.astype(jnp.bfloat16), w2_ref[...],
                  preferred_element_type=jnp.float32)
    o_ref[...] = (out + b2_ref[...]).astype(o_ref.dtype)


def inner_module_forward(x, params, emb):
    """Batch-tiled fused MLP forward.  `params` are already padded / bf16."""
    w1, b1, w2, b2 = params
    batch, in_feat = x.shape
    in_p, hid_p = w1.shape
    emb_p = w2.shape[1]

    # ---- batch tiling: TM rows per grid step, weights resident across tiles ----
    tm = min(_TM_MAX, _round_up(batch, _SUBLANE))
    batch_p = _round_up(batch, tm)
    n_tiles = batch_p // tm

    # Pad + cast the activation to bf16 (matmul operand); zero rows/cols are inert.
    xb = jnp.pad(x.astype(jnp.bfloat16),
                 ((0, batch_p - batch), (0, in_p - in_feat)))

    # ---- scheduling hints ----
    flops = 2 * batch_p * (in_p * hid_p + hid_p * emb_p)
    bytes_accessed = (batch_p * in_p * 2          # x (bf16)
                      + batch_p * emb_p * 4       # out (f32)
                      + in_p * hid_p * 2 + hid_p * emb_p * 2  # weights (bf16)
                      + (hid_p + emb_p) * 4)      # biases (f32)
    # VMEM budget: resident weights + double-buffered x/out tiles + f32 intermediate.
    vmem_need = (in_p * hid_p * 2 + hid_p * emb_p * 2 + (hid_p + emb_p) * 4
                 + 2 * tm * in_p * 2 + 2 * tm * emb_p * 4 + tm * hid_p * 4)
    vmem_limit = min(max(2 * vmem_need, 16 * 1024 * 1024), 48 * 1024 * 1024)

    out = pl.pallas_call(
        _mlp_kernel,
        out_shape=jax.ShapeDtypeStruct((batch_p, emb_p), jnp.float32),
        grid_spec=pltpu.PrefetchScalarGridSpec(
            num_scalar_prefetch=0,
            grid=(n_tiles,),
            in_specs=[
                pl.BlockSpec((tm, in_p), lambda i: (i, 0)),   # stream batch tiles of x
                pl.BlockSpec(w1.shape, lambda i: (0, 0)),     # weights stay resident
                pl.BlockSpec(b1.shape, lambda i: (0, 0)),
                pl.BlockSpec(w2.shape, lambda i: (0, 0)),
                pl.BlockSpec(b2.shape, lambda i: (0, 0)),
            ],
            out_specs=pl.BlockSpec((tm, emb_p), lambda i: (i, 0)),
        ),
        compiler_params=pltpu.CompilerParams(
            dimension_semantics=("parallel",),     # shard batch tiles across TCs (v7x)
            vmem_limit_bytes=vmem_limit),
        cost_estimate=pl.CostEstimate(flops=flops, transcendentals=0,
                                      bytes_accessed=bytes_accessed),
    )(xb, w1, b1, w2, b2)

    return out[:batch, :emb]


class WrappedModel:
    """JAX mirror of SpeakerNet.WrappedModel: forward(x, label) -> module(x, label)."""

    def __init__(self, module):
        self.module = module

    def __call__(self, x, label=None):
        return self.module(x, label)


def make_inner_module(key, in_feat, hidden, emb):
    k1, k2 = jax.random.split(key)
    # Deterministic synthetic init (not a checkpoint load).
    w1 = jax.random.normal(k1, (in_feat, hidden), jnp.float32) * 0.05
    b1 = jnp.zeros((hidden,), jnp.float32)
    w2 = jax.random.normal(k2, (hidden, emb), jnp.float32) * 0.05
    b2 = jnp.zeros((emb,), jnp.float32)

    # Zero-pad every feature dim to a lane-dense multiple of 128; store matmul
    # weights in bf16 (MXU operands) and biases in f32 (epilogue operands).
    in_p = _round_up(in_feat, _LANE)
    hid_p = _round_up(hidden, _LANE)
    emb_p = _round_up(emb, _LANE)

    w1_p = jnp.pad(w1.astype(jnp.bfloat16), ((0, in_p - in_feat), (0, hid_p - hidden)))
    b1_p = jnp.pad(b1, (0, hid_p - hidden)).reshape(1, hid_p)
    w2_p = jnp.pad(w2.astype(jnp.bfloat16), ((0, hid_p - hidden), (0, emb_p - emb)))
    b2_p = jnp.pad(b2, (0, emb_p - emb)).reshape(1, emb_p)
    params = (w1_p, b1_p, w2_p, b2_p)

    def module(x, label=None):
        # `label` is forwarded by WrappedModel; at inference the inner model
        # ignores it and returns speaker embeddings.
        # TODO(synk): loss-head path that consumes `label` is not modeled here.
        return inner_module_forward(x, params, emb)

    def reference(x):
        # Pure-jnp reference using the same bf16-quantized operands.
        batch = x.shape[0]
        xb = jnp.pad(x.astype(jnp.bfloat16).astype(jnp.float32),
                     ((0, 0), (0, in_p - in_feat)))
        h = jnp.maximum(xb @ w1_p.astype(jnp.float32) + b1_p, 0.0)
        o = h.astype(jnp.bfloat16).astype(jnp.float32) @ w2_p.astype(jnp.float32) + b2_p
        return o[:batch, :emb]

    module.reference = reference
    return module


if __name__ == "__main__":
    key = jax.random.PRNGKey(0)
    kx, kp = jax.random.split(key)

    # Small-but-realistic SpeakerNet-ish sizes: 40-dim features, 256 hidden,
    # 192-dim embedding.  batch=1024 so the batch-tiled grid (TM=512) actually
    # runs two pipelined tiles; total data is still only a few hundred KiB.
    batch, in_feat, hidden, emb = 1024, 40, 256, 192
    x = jax.random.normal(kx, (batch, in_feat), jnp.float32)

    module = make_inner_module(kp, in_feat, hidden, emb)
    model = WrappedModel(module)

    out = jax.block_until_ready(model(x, label=None))
    assert out.shape == (batch, emb), out.shape

    ref = module.reference(x)
    max_err = float(jnp.max(jnp.abs(out - ref)))
    assert max_err < 2e-2, f"max abs error {max_err}"

    print("KERNEL_OK")
</pallas_src>

<mosaic_0001>
module attributes {stable_mosaic.version = 11 : i64} {
  func.func @_mlp_kernel(%arg0: i32, %arg1: memref<512x128xbf16, #tpu.memory_space<vmem>>, %arg2: memref<128x256xbf16, #tpu.memory_space<vmem>>, %arg3: memref<1x256xf32, #tpu.memory_space<vmem>>, %arg4: memref<256x256xbf16, #tpu.memory_space<vmem>>, %arg5: memref<1x256xf32, #tpu.memory_space<vmem>>, %arg6: memref<512x256xf32, #tpu.memory_space<vmem>>) attributes {dimension_semantics = [#tpu.dimension_semantics<parallel>], iteration_bounds = array<i64: 2>, scalar_prefetch = 0 : i64, scratch_operands = 0 : i64, tpu.core_type = #tpu.core_type<tc>, window_params = [{transform_indices = @transform_0, window_bounds = array<i64: 512, 128>}, {pipeline_mode = #tpu.pipeline_mode<synchronous>, transform_indices = @transform_1, window_bounds = array<i64: 128, 256>}, {pipeline_mode = #tpu.pipeline_mode<synchronous>, transform_indices = @transform_2, window_bounds = array<i64: 1, 256>}, {pipeline_mode = #tpu.pipeline_mode<synchronous>, transform_indices = @transform_3, window_bounds = array<i64: 256, 256>}, {pipeline_mode = #tpu.pipeline_mode<synchronous>, transform_indices = @transform_4, window_bounds = array<i64: 1, 256>}, {transform_indices = @transform_5, window_bounds = array<i64: 512, 256>}]} {
    %c0 = arith.constant 0 : index
    %c0_0 = arith.constant 0 : index
    %0 = vector.load %arg1[%c0, %c0_0] : memref<512x128xbf16, #tpu.memory_space<vmem>>, vector<512x128xbf16>
    %c0_1 = arith.constant 0 : index
    %c0_2 = arith.constant 0 : index
    %1 = vector.load %arg2[%c0_1, %c0_2] : memref<128x256xbf16, #tpu.memory_space<vmem>>, vector<128x256xbf16>
    %cst = arith.constant dense<0.000000e+00> : vector<512x256xf32>
    %2 = tpu.matmul %0, %1, %cst {dimension_numbers = #tpu.dot_dimension_numbers<[1], [0], [0], [1], [0, 0, 1, 1], [], []>} : vector<512x128xbf16>, vector<128x256xbf16>, vector<512x256xf32> -> vector<512x256xf32>
    %c0_3 = arith.constant 0 : index
    %c0_4 = arith.constant 0 : index
    %3 = vector.load %arg3[%c0_3, %c0_4] : memref<1x256xf32, #tpu.memory_space<vmem>>, vector<1x256xf32>
    %4 = vector.broadcast %3 : vector<1x256xf32> to vector<512x256xf32>
    %5 = arith.addf %2, %4 : vector<512x256xf32>
    %cst_5 = arith.constant 0.000000e+00 : f32
    %6 = vector.broadcast %cst_5 : f32 to vector<512x256xf32>
    %7 = arith.maximumf %5, %6 : vector<512x256xf32>
    %8 = arith.truncf %7 : vector<512x256xf32> to vector<512x256xbf16>
    %c0_6 = arith.constant 0 : index
    %c0_7 = arith.constant 0 : index
    %9 = vector.load %arg4[%c0_6, %c0_7] : memref<256x256xbf16, #tpu.memory_space<vmem>>, vector<256x256xbf16>
    %cst_8 = arith.constant dense<0.000000e+00> : vector<512x256xf32>
    %10 = tpu.matmul %8, %9, %cst_8 {dimension_numbers = #tpu.dot_dimension_numbers<[1], [0], [0], [1], [0, 0, 1, 1], [], []>} : vector<512x256xbf16>, vector<256x256xbf16>, vector<512x256xf32> -> vector<512x256xf32>
    %c0_9 = arith.constant 0 : index
    %c0_10 = arith.constant 0 : index
    %11 = vector.load %arg5[%c0_9, %c0_10] : memref<1x256xf32, #tpu.memory_space<vmem>>, vector<1x256xf32>
    %12 = vector.broadcast %11 : vector<1x256xf32> to vector<512x256xf32>
    %13 = arith.addf %10, %12 : vector<512x256xf32>
    %c0_11 = arith.constant 0 : index
    %c0_12 = arith.constant 0 : index
    %14 = vector.load %arg6[%c0_11, %c0_12] : memref<512x256xf32, #tpu.memory_space<vmem>>, vector<512x256xf32>
    tpu.vector_store %arg6[%c0_11, %c0_12], %13 {strides = array<i32>} : memref<512x256xf32, #tpu.memory_space<vmem>>, vector<512x256xf32>,
    return
  }
  func.func @transform_0(%arg0: i32) -> (i32, i32) {
    %c0_i32 = arith.constant 0 : i32
    %c0_i32_0 = arith.constant 0 : i32
    return %arg0, %c0_i32 : i32, i32
  }
  func.func @transform_1(%arg0: i32) -> (i32, i32) {
    %c0_i32 = arith.constant 0 : i32
    %c0_i32_0 = arith.constant 0 : i32
    %c0_i32_1 = arith.constant 0 : i32
    return %c0_i32, %c0_i32_0 : i32, i32
  }
  func.func @transform_2(%arg0: i32) -> (i32, i32) {
    %c0_i32 = arith.constant 0 : i32
    %c0_i32_0 = arith.constant 0 : i32
    %c0_i32_1 = arith.constant 0 : i32
    return %c0_i32, %c0_i32_0 : i32, i32
  }
  func.func @transform_3(%arg0: i32) -> (i32, i32) {
    %c0_i32 = arith.constant 0 : i32
    %c0_i32_0 = arith.constant 0 : i32
    %c0_i32_1 = arith.constant 0 : i32
    return %c0_i32, %c0_i32_0 : i32, i32
  }
  func.func @transform_4(%arg0: i32) -> (i32, i32) {
    %c0_i32 = arith.constant 0 : i32
    %c0_i32_0 = arith.constant 0 : i32
    %c0_i32_1 = arith.constant 0 : i32
    return %c0_i32, %c0_i32_0 : i32, i32
  }
  func.func @transform_5(%arg0: i32) -> (i32, i32) {
    %c0_i32 = arith.constant 0 : i32
    %c0_i32_0 = arith.constant 0 : i32
    return %arg0, %c0_i32 : i32, i32
  }
}

</mosaic_0001>

<bundles_post_ra>
// kernel: tpu_custom_call.1
= control target key start
LH: loop header
LB: loop body
LE: loop exit
PB: predicated region body
PF: predicated region fallthrough
CT: control target
= control target key end

     0   :  { %10 = vsyncpa [#allocation3], 0  ;;  %s3171_s0 = inlined_call_operand.hbm [shape: bf16[1024,128], index: 0, kind: input, shape index: {}]   ;;  %s3172_s1 = inlined_call_operand.hbm [shape: bf16[128,256], index: 1, kind: input, shape index: {}]   ;;  %s3173_s2 = inlined_call_operand.vmem [shape: f32[1,256], index: 2, kind: input, shape index: {}]   ;;  %s3174_s3 = inlined_call_operand.hbm [shape: bf16[256,256], index: 3, kind: input, shape index: {}]   ;;  %s3175_s4 = inlined_call_operand.vmem [shape: f32[1,256], index: 4, kind: input, shape index: {}]   ;;  %s3176_s5 = inlined_call_operand.hbm [shape: f32[1024,256], index: 5, kind: output, shape index: {}]  }
   0x1   :  { %12 = vsyncpa [#allocation3 + $0x1], 0 }
   0x2   :  { %13 = vsyncpa [#allocation6], 0 }
   0x3   :  { %14 = vsyncpa [#allocation4], 0 }
   0x4   :  { %16 = vsyncpa [#allocation4 + $0x1], 0  ;;  %s2479_s18 = smov 0   ;;  %s2481_s19 = smov 0  }
   0x5   :  { %s2483_s20 = smov 0   ;;  %s2485_s21 = smov 0  }
   0x6 LB: > { %s2500_s22 = sadd.s32 4294967295, %s2436_s21   ;;  %s1976_s23 = sadd.s32 4294967294, %s2436_s21   ;;  %s2436_s21 = sphi %s2485_s21, %s3198_s21   ;;  %s2432_s20 = sphi %s2483_s20, %s3197_s20   ;;  %s2428_s19 = sphi %s2481_s19, %s3196_s19   ;;  %s2424_s18 = sphi %s2479_s18, %s3195_s18  }
   0x7   : > { %p42_p0 = scmp.ne.s32.totalorder %s2428_s19, %s2424_s18  ;;  %p3177_p1 = scmp.eq.s32.totalorder %s2500_s22, 0 }
   0x8   : > { %p156_p3 = scmp.eq.s32.totalorder %s1976_s23, 1  ;;  %p1977_p5 = scmp.ge.s32.totalorder %s2436_s21, 1 }
   0x9   : > { %p2509_p4 = por %p3177_p1, %p42_p0  ;;  %p163_p7 = scmp.lt.s32.totalorder %s2436_s21, 3 }
   0xa   : > { %p2514_p6 = por %p156_p3, %p42_p0  ;;  %s2438_s27 = smov [#allocation5]  }
   0xb   : > { %s3181_s24 = scalar_select %p2509_p4, 1, 0 }
   0xc   : > { %s3182_s25 = scalar_select %p2514_p6, 1, 0 }
   0xd   : > { %p2519_p8 = pnand %p1977_p5, %p163_p7  ;;  %s175_s28 = sshll.u32 %s2438_s27, 4  ;;  %s176_s28 = int_to_ptr.vmem [resolvable:$true] %s175_s28 }
   0xe   : > { %s2439_s30 = smov [#allocation7]   ;;  %s2299_s7 = scalar_lea.vmem %s176_s28, 2048 }
   0xf   : > { %s3183_s26 = scalar_select %p2519_p8, 1, 0 }
  0x10   : > { %p2122_p9 = pneg %p2519_p8  ;;  %s191_s6 = sshll.u32 %s2439_s30, 4  ;;  %s192_s6 = int_to_ptr.vmem [resolvable:$true] %s191_s6 }
  0x11   : > { %p2300_p13 = scmp.ne.s32.totalorder %s176_s28, %s2299_s7  ;;  %p2307_p5 = scmp.lt.s32.totalorder %s176_s28, %s176_s28 }
  0x12   : > { %p2528_p11 = pnand %p2122_p9, %p3177_p1  ;;  %p2308_p7 = scmp.lt.s32.totalorder %s2299_s7, %s2299_s7 }
  0x14   : > { %p2290_p12 = pneg %p2528_p11  ;;  %p2309_p10 = por %p2308_p7, %p2307_p5 }
  0x16   : > { %p2302_p0 = pnand %p2300_p13, %p2290_p12 }
  0x18   : > { %p2303_p3 = pneg %p2302_p0 }
  0x1a   : > { %p2310_p9 = pnand %p2309_p10, %p2303_p3 }
  0x1c   : > { %2313 = shalt.err (!%p2310_p9)
}
  0x1d   : > { %s2440_s8 = smov 128   ;;  %s2441_s9 = smov 8  }
  0x1e   : > { %2125 = dma.hbm_to_vmem [thread:$0]  (!%p2528_p11), %s3172_s1, 2048, %s176_s28, [#allocation6], %s2440_s8, %s2440_s8, %s2441_s9  }
  0x1f   : > { %s2325_s12 = scalar_lea.vmem %s192_s6, 4096  ;;  %p2333_p2 = scmp.lt.s32.totalorder %s192_s6, %s192_s6 }
  0x20   : > { %p2326_p1 = scmp.ne.s32.totalorder %s192_s6, %s2325_s12  ;;  %p2334_p6 = scmp.lt.s32.totalorder %s2325_s12, %s2325_s12 }
  0x22   : > { %p2328_p13 = pnand %p2326_p1, %p2290_p12  ;;  %p2335_p5 = por %p2334_p6, %p2333_p2 }
  0x24   : > { %p2329_p0 = pneg %p2328_p13 }
  0x26   : > { %p2336_p10 = pnand %p2335_p5, %p2329_p0 }
  0x28   : > { %2339 = shalt.err (!%p2336_p10)
}
  0x29   : > { %2128 = dma.hbm_to_vmem [thread:$0]  (!%p2528_p11), %s3174_s3, 4096, %s192_s6, [#allocation6], %s2440_s8, %s2440_s8, %s2441_s9  }
  0x2a   : > { %s2551_s15 = sadd.s32 1, %s2436_s21   ;;  %s29_s16 = sadd.s32 1, %s2432_s20 }
  0x2b   : > { %s26_s17 = ssub.s32 %s2436_s21, %s2551_s15  ;;  %p36_p1 = scmp.ne.s32.totalorder %s2432_s20, %s2428_s19 }
  0x2c   : > { %p27_p2 = scmp.eq.s32.totalorder %s26_s17, 0  ;;  %p37_p6 = scmp.eq.s32.totalorder %s2436_s21, 0 }
  0x2d   : > { %p3185_p12 = scmp.eq.s32.totalorder %s2500_s22, 1  ;;  %p2139_p7 = scmp.lt.s32.totalorder %s2436_s21, 2 }
  0x2e   : > { %s2567_s27 = scalar_select %p27_p2, %s2432_s20, %s29_s16  }
  0x2f   : > { %p2561_p3 = por %p3185_p12, %p36_p1  ;;  %p38_p9 = por %p37_p6, %p36_p1 }
  0x30   : > { %s208_s28 = sand.u32 1, %s2432_s20   ;;  %s2075_s30 = sshll.u32 %s2436_s21, 12 }
  0x31   : > { %s3186_s23 = scalar_select %p2561_p3, 1, 0 }
  0x32   : > { %s1981_s29 = sshll.u32 %s208_s28, 8  ;;  %s2574_s8 = scalar_lea.hbm %s3171_s0, %s2075_s30 }
  0x33   : > { %s212_s9 = scalar_lea.vmem [#allocation2], %s1981_s29  ;;  %p2578_p11 = pnand %p2139_p7, %p38_p9 }
  0x34   : > { %s219_s10 = sshll.u32 %s212_s9, 4  ;;  %s2582_s12 = scalar_lea.sflag [#allocation3], %s208_s28  ;;  %s2576_s10 = int_to_ptr.vmem [resolvable:$true] %s219_s10 }
  0x35   : > { %s2340_s13 = scalar_lea.hbm %s2574_s8, 4096  ;;  %p2342_p0 = pneg %p2578_p11 }
  0x36   : > { %p2341_p13 = scmp.ne.s32.totalorder %s2574_s8, %s2340_s13  ;;  %s2345_s17 = scalar_lea.hbm %s3171_s0, 8192 }
  0x37   : > { %p2346_p1 = scmp.lt.s32.totalorder %s2574_s8, %s3171_s0  ;;  %p2347_p2 = scmp.lt.s32.totalorder %s2345_s17, %s2340_s13 }
  0x38   : > { %p2343_p5 = pnand %p2342_p0, %p2341_p13 }
  0x39   : > { %p2348_p6 = por %p2347_p2, %p2346_p1 }
  0x3a   : > { %p2344_p10 = pneg %p2343_p5 }
  0x3c   : > { %p2349_p12 = pnand %p2348_p6, %p2344_p10 }
  0x3e   : > { %2352 = shalt.err (!%p2349_p12)
}
  0x3f   : > { %s2353_s28 = scalar_lea.vmem %s2576_s10, 4096  ;;  %s2442_s6 = smov [#allocation2]  }
  0x40   : > { %p2354_p7 = scmp.ne.s32.totalorder %s2576_s10, %s2353_s28  ;;  %s2358_s7 = sshll.u32 %s2442_s6, 4  ;;  %s2359_s7 = int_to_ptr.vmem [resolvable:$false] %s2358_s7 }
  0x41   : > { %s2360_s9 = scalar_lea.vmem %s2359_s7, 8192  ;;  %p2361_p5 = scmp.lt.s32.totalorder %s2576_s10, %s2359_s7 }
  0x42   : > { %p2356_p9 = pnand %p2354_p7, %p2342_p0  ;;  %p2362_p3 = scmp.lt.s32.totalorder %s2360_s9, %s2353_s28 }
  0x44   : > { %p2357_p13 = pneg %p2356_p9  ;;  %p2363_p4 = por %p2362_p3, %p2361_p5 }
  0x46   : > { %p2364_p8 = pnand %p2363_p4, %p2357_p13 }
  0x48   : > { %2367 = shalt.err (!%p2364_p8)
}
  0x49   : > { %s2443_s13 = smov 64   ;;  %s2444_s14 = smov 4  }
  0x4a   : > { %2132 = dma.hbm_to_vmem [thread:$0]  (!%p2578_p11), %s2574_s8, 4096, %s2576_s10, %s2582_s12, %s2443_s13, %s2443_s13, %s2444_s14  }
  0x4b   : > { %p3188_p0 = scmp.ne.s32.totalorder %s3183_s26, 0 }
  0x4c   : > { %s2606_s16 = sand.u32 (!%p3188_p0), 1, %s2428_s19   ;;  %p3189_p4 = scmp.ne.s32.totalorder (!%p3188_p0), %s3181_s24, 0 }
  0x4d   : > { %231 = sbr.rel (%p3188_p0) target bundleno = 788 (0x314), region = 40  ;;  %s1985_s17 = sshll.u32 (!%p3188_p0), %s2606_s16, 8 }
  0x4e   : > { %s234_s29 = scalar_lea.sflag (!%p3188_p0), [#allocation3], %s2606_s16  ;;  %s2610_s30 = scalar_lea.vmem (!%p3188_p0), [#allocation2], %s1985_s17 }
  0x52   : > { %2411 = dma.done.wait (%p3189_p4), %s234_s29, 4096  }
  0x53   : > { %2413 = vsyncadd (%p3189_p4), %s234_s29, 4294963200  ;;  %p3190_p8 = scmp.eq.s32.totalorder %s2500_s22, 0 }
  0x55   : > { %2415 = dma.done.wait (%p3190_p8), [#allocation6], 6144   ;;  %p3191_p3 = pmov %p3190_p8 }
  0x56   : > { %v2445_v0 = vmov 0   ;;  %v2184_v1 = vld [vmem:[#allocation5 + $0x74] ss:$8 sps:$4 sm:$0xff]   ;;  %v2186_v2 = vld [vmem:[#allocation5 + $0x70] ss:$8 sps:$4 sm:$0xff]   ;;  %v2208_v17 = vld [vmem:[%s2610_s30] sm:$0xff]  }
  0x57   : > { %2417 = vsyncadd (%p3191_p3), [#allocation6], 4294961152  ;;  %671 = vmatprep.mubr.bf16.mxu0 %v2445_v0  ;;  %639 = vmatprep.subr.bf16.mxu0 %v2184_v1  ;;  %v2187_v3 = vld [vmem:[#allocation5 + $0x64] ss:$8 sps:$4 sm:$0xff]   ;;  %v2189_v4 = vld [vmem:[#allocation5 + $0x60] ss:$8 sps:$4 sm:$0xff]  }
  0x58   : > { %640 = vmatpush1.bf16.msra.mxu0 %v2186_v2  ;;  %v2190_v5 = vld [vmem:[#allocation5 + $0x54] ss:$8 sps:$4 sm:$0xff]   ;;  %v2192_v6 = vld [vmem:[#allocation5 + $0x50] ss:$8 sps:$4 sm:$0xff]   ;;  %v2193_v7 = vld [vmem:[#allocation5 + $0x44] ss:$8 sps:$4 sm:$0xff]  }
  0x59   : > { %641 = vmatprep.subr.bf16.mxu0 %v2187_v3  ;;  %v2195_v8 = vld [vmem:[#allocation5 + $0x40] ss:$8 sps:$4 sm:$0xff]   ;;  %v2196_v9 = vld [vmem:[#allocation5 + $0x34] ss:$8 sps:$4 sm:$0xff]   ;;  %v2198_v10 = vld [vmem:[#allocation5 + $0x30] ss:$8 sps:$4 sm:$0xff]  }
  0x5a   : > { %v2199_v11 = vld [vmem:[#allocation5 + $0x24] ss:$8 sps:$4 sm:$0xff]   ;;  %v2201_v12 = vld [vmem:[#allocation5 + $0x20] ss:$8 sps:$4 sm:$0xff]   ;;  %v2202_v13 = vld [vmem:[#allocation5 + $0x14] ss:$8 sps:$4 sm:$0xff]  }
  0x5b   : > { %v2204_v14 = vld [vmem:[#allocation5 + $0x10] ss:$8 sps:$4 sm:$0xff]   ;;  %v2205_v15 = vld [vmem:[#allocation5 + $0x4] ss:$8 sps:$4 sm:$0xff]   ;;  %v2207_v16 = vld [vmem:[#allocation5] ss:$8 sps:$4 sm:$0xff]  }
  0x5c   : > { %642 = vmatpush1.bf16.msra.mxu0 %v2189_v4  ;;  %v2209_v18 = vld [vmem:[%s2610_s30 + $0x8] sm:$0xff]   ;;  %v2210_v19 = vld [vmem:[%s2610_s30 + $0x10] sm:$0xff]   ;;  %v2211_v20 = vld [vmem:[%s2610_s30 + $0x18] sm:$0xff]   ;;  %s1988_s11 = sshll.u32 %s2606_s16, 10  ;;  %s2077_s28 = sshll.u32 %s2500_s22, 14 }
  0x5d   : > { %643 = vmatprep.subr.bf16.mxu0 %v2190_v5  ;;  %v2228_v21 = vld [vmem:[#allocation7 + $0x74] ss:$8 sps:$4 sm:$0xff]   ;;  %v2230_v22 = vld [vmem:[#allocation7 + $0x70] ss:$8 sps:$4 sm:$0xff]   ;;  %v2212_v23 = vld [vmem:[%s2610_s30 + $0x20] sm:$0xff]   ;;  %s2848_s12 = scalar_lea.vmem [#allocation8], %s1988_s11  ;;  %s3123_s13 = scalar_lea.hbm %s3176_s5, %s2077_s28 }
  0x5e   : > { %2078 = vmatprep.subr.bf16.mxu1 %v2228_v21  ;;  %v2232_v24 = vld [vmem:[#allocation7 + $0x64] ss:$8 sps:$4 sm:$0xff]   ;;  %v2234_v25 = vld [vmem:[#allocation7 + $0x60] ss:$8 sps:$4 sm:$0xff]   ;;  %v2235_v26 = vld [vmem:[#allocation7 + $0x54] ss:$8 sps:$4 sm:$0xff]  }
  0x5f   : > { %2094 = vmatpush1.bf16.msra.mxu1 %v2230_v22  ;;  %v2237_v27 = vld [vmem:[#allocation7 + $0x50] ss:$8 sps:$4 sm:$0xff]   ;;  %v2213_v28 = vld [vmem:[%s2610_s30 + $0x28] sm:$0xff]   ;;  %v2242_v31 = vld [vmem:[#allocation7 + $0x34] ss:$8 sps:$4 sm:$0xff]   ;;  %s1884_s6 = sshll.u32 %s2848_s12, 4  ;;  %s3125_s6 = int_to_ptr.vmem [resolvable:$true] %s1884_s6 }
  0x60   : > { %644 = vmatpush1.bf16.msra.mxu0 %v2192_v6  ;;  %2079 = vmatprep.subr.bf16.mxu1 %v2232_v24  ;;  %v2239_v29 = vld [vmem:[#allocation7 + $0x44] ss:$8 sps:$4 sm:$0xff]   ;;  %v2241_v30 = vld [vmem:[#allocation7 + $0x40] ss:$8 sps:$4 sm:$0xff]   ;;  %v2244_v32 = vld [vmem:[#allocation7 + $0x30] ss:$8 sps:$4 sm:$0xff]  }
  0x61   : > { %645 = vmatprep.subr.bf16.mxu0 %v2193_v7  ;;  %v2214_v33 = vld [vmem:[%s2610_s30 + $0x30] sm:$0xff]   ;;  %v2246_v34 = vld [vmem:[#allocation7 + $0x24] ss:$8 sps:$4 sm:$0xff]   ;;  %v2248_v35 = vld [vmem:[#allocation7 + $0x20] ss:$8 sps:$4 sm:$0xff]   ;;  %s1870_s22 = scalar_lea.sflag [#allocation4], %s2606_s16 }
  0x62   : > { %v2249_v36 = vld [vmem:[#allocation7 + $0x14] ss:$8 sps:$4 sm:$0xff]   ;;  %v2251_v37 = vld [vmem:[#allocation7 + $0x10] ss:$8 sps:$4 sm:$0xff]   ;;  %v2253_v39 = vld [vmem:[#allocation7 + $0x4] ss:$8 sps:$4 sm:$0xff]  }
  0x63   : > { %2095 = vmatpush1.bf16.msra.mxu1 %v2234_v25  ;;  %v2215_v38 = vld [vmem:[%s2610_s30 + $0x38] sm:$0xff]   ;;  %v2255_v40 = vld [vmem:[#allocation7] ss:$8 sps:$4 sm:$0xff]   ;;  %v2260_v44 = vld [vmem:[#allocation7 + $0xe4] ss:$8 sps:$4 sm:$0xff]   ;;  %s2368_s14 = scalar_lea.vmem %s3125_s6, 16384 }
  0x64   : > { %646 = vmatpush1.bf16.msra.mxu0 %v2195_v8  ;;  %2080 = vmatprep.subr.bf16.mxu1 %v2235_v26  ;;  %v2256_v41 = vld [vmem:[#allocation7 + $0xf4] ss:$8 sps:$4 sm:$0xff]   ;;  %v2258_v42 = vld [vmem:[#allocation7 + $0xf0] ss:$8 sps:$4 sm:$0xff]   ;;  %v2216_v43 = vld [vmem:[%s2610_s30 + $0x40] sm:$0xff]   ;;  %p2369_p11 = scmp.ne.s32.totalorder %s3125_s6, %s2368_s14  ;;  %p3192_p10 = scmp.ne.s32.totalorder %s3186_s23, 0 }
  0x65   : > { %647 = vmatprep.subr.bf16.mxu0 %v2196_v9  ;;  %v2262_v45 = vld [vmem:[#allocation7 + $0xe0] ss:$8 sps:$4 sm:$0xff]   ;;  %v2263_v47 = vld [vmem:[#allocation7 + $0xd4] ss:$8 sps:$4 sm:$0xff]   ;;  %v2265_v48 = vld [vmem:[#allocation7 + $0xd0] ss:$8 sps:$4 sm:$0xff]  }
  0x66   : > { %v2217_v46 = vld [vmem:[%s2610_s30 + $0x48] sm:$0xff]   ;;  %v2218_v51 = vld [vmem:[%s2610_s30 + $0x50] sm:$0xff]   ;;  %v2219_v56 = vld [vmem:[%s2610_s30 + $0x58] sm:$0xff]   ;;  %p2370_p1 = pnand %p2369_p11, %p3192_p10  ;;  %s2446_s17 = smov [#allocation8]  }
  0x67   : > { %2096 = vmatpush1.bf16.msra.mxu1 %v2237_v27  ;;  %v2267_v49 = vld [vmem:[#allocation7 + $0xc4] ss:$8 sps:$4 sm:$0xff]   ;;  %v2269_v50 = vld [vmem:[#allocation7 + $0xc0] ss:$8 sps:$4 sm:$0xff]   ;;  %v2270_v52 = vld [vmem:[#allocation7 + $0xb4] ss:$8 sps:$4 sm:$0xff]  }
  0x68   : > { %648 = vmatpush1.bf16.msra.mxu0 %v2198_v10  ;;  %2081 = vmatprep.subr.bf16.mxu1 %v2239_v29  ;;  %v2272_v53 = vld [vmem:[#allocation7 + $0xb0] ss:$8 sps:$4 sm:$0xff]   ;;  %v2274_v54 = vld [vmem:[#allocation7 + $0xa4] ss:$8 sps:$4 sm:$0xff]   ;;  %v2276_v55 = vld [vmem:[#allocation7 + $0xa0] ss:$8 sps:$4 sm:$0xff]   ;;  %p2371_p2 = pneg %p2370_p1 }
  0x69   : > { %649 = vmatprep.subr.bf16.mxu0 %v2199_v11  ;;  %v2277_v57 = vld [vmem:[#allocation7 + $0x94] ss:$8 sps:$4 sm:$0xff]   ;;  %v2279_v58 = vld [vmem:[#allocation7 + $0x90] ss:$8 sps:$4 sm:$0xff]   ;;  %v2281_v59 = vld [vmem:[#allocation7 + $0x84] ss:$8 sps:$4 sm:$0xff]  }
  0x6a   : > { %v2283_v60 = vld [vmem:[#allocation7 + $0x80] ss:$8 sps:$4 sm:$0xff]   ;;  %v2222_v63 = vld [vmem:[%s2610_s30 + $0x70] sm:$0xff]   ;;  %v2223_v1 = vld [vmem:[%s2610_s30 + $0x78] sm:$0xff]   ;;  %s2372_s29 = sshll.u32 %s2446_s17, 4  ;;  %s2373_s29 = int_to_ptr.vmem [resolvable:$false] %s2372_s29 }
  0x6b   : > { %2097 = vmatpush1.bf16.msra.mxu1 %v2241_v30  ;;  %v2220_v61 = vld [vmem:[%s2610_s30 + $0x60] sm:$0xff]   ;;  %v2221_v62 = vld [vmem:[%s2610_s30 + $0x68] sm:$0xff]   ;;  %v2226_v4 = vld [vmem:[%s2610_s30 + $0x90] sm:$0xff]   ;;  %p2375_p6 = scmp.lt.s32.totalorder %s3125_s6, %s2373_s29 }
  0x6c   : > { %650 = vmatpush1.bf16.msra.mxu0 %v2201_v12  ;;  %2082 = vmatprep.subr.bf16.mxu1 %v2242_v31  ;;  %v2224_v2 = vld [vmem:[%s2610_s30 + $0x80] sm:$0xff]   ;;  %v2225_v3 = vld [vmem:[%s2610_s30 + $0x88] sm:$0xff]   ;;  %v2227_v5 = vld [vmem:[%s2610_s30 + $0x98] sm:$0xff]  }
  0x6d   : > { %651 = vmatprep.subr.bf16.mxu0 %v2202_v13  ;;  %v2231_v6 = vld [vmem:[%s2610_s30 + $0xa0] sm:$0xff]   ;;  %v2238_v7 = vld [vmem:[%s2610_s30 + $0xa8] sm:$0xff]   ;;  %v2245_v8 = vld [vmem:[%s2610_s30 + $0xb0] sm:$0xff]  }
  0x6e   : > { %v2252_v9 = vld [vmem:[%s2610_s30 + $0xb8] sm:$0xff]   ;;  %v2259_v10 = vld [vmem:[%s2610_s30 + $0xc0] sm:$0xff]  }
  0x6f   : > { %2098 = vmatpush1.bf16.msra.mxu1 %v2244_v32 }
  0x70   : > { %652 = vmatpush1.bf16.msra.mxu0 %v2204_v14  ;;  %2083 = vmatprep.subr.bf16.mxu1 %v2246_v34  ;;  %v2266_v14 = vld [vmem:[%s2610_s30 + $0xc8] sm:$0xff]  }
  0x71   : > { %653 = vmatprep.subr.bf16.mxu0 %v2205_v15 }
  0x73   : > { %2099 = vmatpush1.bf16.msra.mxu1 %v2248_v35 }
  0x74   : > { %654 = vmatpush1.bf16.msra.mxu0 %v2207_v16  ;;  %2084 = vmatprep.subr.bf16.mxu1 %v2249_v36  ;;  %v357_v16 = vlaneseq }
  0x75   : > { %1388 = vmatprep.subr.bf16.mxu0 %v2228_v21  ;;  %v2273_v21 = vld [vmem:[%s2610_s30 + $0xd0] sm:$0xff]  }
  0x77   : > { %672 = vmatmul.mubr.bf16.vlgmr.msra.gmra.mxu0 %v2208_v17  ;;  %2100 = vmatpush1.bf16.msra.mxu1 %v2251_v37 }
  0x78   : > { %681 = vmatprep.mubr.bf16.mxu0 %v2445_v0  ;;  %1389 = vmatpush1.bf16.msra.mxu0 %v2230_v22 }
  0x79   : > { %1390 = vmatprep.subr.bf16.mxu0 %v2232_v24  ;;  %2085 = vmatprep.subr.bf16.mxu1 %v2253_v39 }
  0x7b   : > { %2101 = vmatpush1.bf16.msra.mxu1 %v2255_v40 }
  0x7c   : > { %1391 = vmatpush1.bf16.msra.mxu0 %v2234_v25  ;;  %2086 = vmatprep.subr.bf16.mxu1 %v2256_v41  ;;  %v355_v25 = vld [vmem:[%s3173_s2] sm:$0x3] }
  0x7d   : > { %1392 = vmatprep.subr.bf16.mxu0 %v2235_v26 }
  0x7f   : > { %682 = vmatmul.mubr.bf16.gmra.mxu0 %v2209_v18  ;;  %2102 = vmatpush2.bf16.msra.mxu1 %v2258_v42 }
  0x80   : > { %691 = vmatprep.mubr.bf16.mxu0 %v2445_v0  ;;  %1393 = vmatpush1.bf16.msra.mxu0 %v2237_v27 }
  0x81   : > { %1394 = vmatprep.subr.bf16.mxu0 %v2239_v29  ;;  %2087 = vmatprep.subr.bf16.mxu1 %v2260_v44 }
  0x83   : > { %2103 = vmatpush2.bf16.msra.mxu1 %v2262_v45 }
  0x84   : > { %1395 = vmatpush1.bf16.msra.mxu0 %v2241_v30  ;;  %2088 = vmatprep.subr.bf16.mxu1 %v2263_v47 }
  0x85   : > { %1396 = vmatprep.subr.bf16.mxu0 %v2242_v31  ;;  %v2280_v31 = vld [vmem:[%s2610_s30 + $0xd8] sm:$0xff]  }
  0x87   : > { %692 = vmatmul.mubr.bf16.gmra.mxu0 %v2210_v19  ;;  %2104 = vmatpush2.bf16.msra.mxu1 %v2265_v48  ;;  %v2685_v19 = vshrl.u32 %v357_v16, 7 }
  0x88   : > { %701 = vmatprep.mubr.bf16.mxu0 %v2445_v0  ;;  %1397 = vmatpush1.bf16.msra.mxu0 %v2244_v32 }
  0x89   : > { %1398 = vmatprep.subr.bf16.mxu0 %v2246_v34  ;;  %2089 = vmatprep.subr.bf16.mxu1 %v2267_v49  ;;  %v363_v24 = vsub.s32 1, %v2685_v19 }
  0x8b   : > { %2105 = vmatpush2.bf16.msra.mxu1 %v2269_v50  ;;  %v2704_v29 = vrot.slane %v355_v25, %v363_v24 }
  0x8c   : > { %1399 = vmatpush1.bf16.msra.mxu0 %v2248_v35  ;;  %2090 = vmatprep.subr.bf16.mxu1 %v2270_v52 }
  0x8d   : > { %1400 = vmatprep.subr.bf16.mxu0 %v2249_v36 }
  0x8f   : > { %702 = vmatmul.mubr.bf16.gmra.mxu0 %v2211_v20  ;;  %2106 = vmatpush2.bf16.msra.mxu1 %v2272_v53 }
  0x90   : > { %711 = vmatprep.mubr.bf16.mxu0 %v2445_v0  ;;  %1401 = vmatpush1.bf16.msra.mxu0 %v2251_v37 }
  0x91   : > { %1402 = vmatprep.subr.bf16.mxu0 %v2253_v39  ;;  %2091 = vmatprep.subr.bf16.mxu1 %v2274_v54 }
  0x93   : > { %2107 = vmatpush2.bf16.msra.mxu1 %v2276_v55 }
  0x94   : > { %1403 = vmatpush1.bf16.msra.mxu0 %v2255_v40  ;;  %2092 = vmatprep.subr.bf16.mxu1 %v2277_v57 }
  0x95   : > { %1404 = vmatprep.subr.bf16.mxu0 %v2256_v41 }
  0x97   : > { %712 = vmatmul.mubr.bf16.gmra.mxu0 %v2212_v23  ;;  %2108 = vmatpush2.bf16.msra.mxu1 %v2279_v58  ;;  %v359_v23 = vsub.s32 0, %v2685_v19 }
  0x98   : > { %721 = vmatprep.mubr.bf16.mxu0 %v2445_v0  ;;  %1405 = vmatpush2.bf16.msra.mxu0 %v2258_v42 }
  0x99   : > { %1406 = vmatprep.subr.bf16.mxu0 %v2260_v44  ;;  %2093 = vmatprep.subr.bf16.mxu1 %v2281_v59 }
  0x9b   : > { %2109 = vmatpush2.bf16.msra.mxu1 %v2283_v60 }
  0x9c   : > { %1407 = vmatpush2.bf16.msra.mxu0 %v2262_v45 }
  0x9d   : > { %1408 = vmatprep.subr.bf16.mxu0 %v2263_v47 }
  0x9f   : > { %722 = vmatmul.mubr.bf16.gmra.mxu0 %v2213_v28  ;;  %v2700_v28 = vrot.slane %v355_v25, %v359_v23 }
  0xa0   : > { %731 = vmatprep.mubr.bf16.mxu0 %v2445_v0  ;;  %1409 = vmatpush2.bf16.msra.mxu0 %v2265_v48 }
  0xa1   : > { %1410 = vmatprep.subr.bf16.mxu0 %v2267_v49 }
  0xa4   : > { %1411 = vmatpush2.bf16.msra.mxu0 %v2269_v50 }
  0xa5   : > { %1412 = vmatprep.subr.bf16.mxu0 %v2270_v52 }
  0xa7   : > { %732 = vmatmul.mubr.bf16.gmra.mxu0 %v2214_v33 }
  0xa8   : > { %741 = vmatprep.mubr.bf16.mxu0 %v2445_v0  ;;  %1413 = vmatpush2.bf16.msra.mxu0 %v2272_v53 }
  0xa9   : > { %1414 = vmatprep.subr.bf16.mxu0 %v2274_v54 }
  0xac   : > { %1415 = vmatpush2.bf16.msra.mxu0 %v2276_v55 }
  0xad   : > { %1416 = vmatprep.subr.bf16.mxu0 %v2277_v57 }
  0xaf   : > { %742 = vmatmul.mubr.bf16.gmra.mxu0 %v2215_v38 }
  0xb0   : > { %751 = vmatprep.mubr.bf16.mxu0 %v2445_v0  ;;  %1417 = vmatpush2.bf16.msra.mxu0 %v2279_v58 }
  0xb1   : > { %1418 = vmatprep.subr.bf16.mxu0 %v2281_v59 }
  0xb4   : > { %1419 = vmatpush2.bf16.msra.mxu0 %v2283_v60 }
  0xb7   : > { %752 = vmatmul.mubr.bf16.gmra.mxu0 %v2216_v43 }
  0xb8   : > { %761 = vmatprep.mubr.bf16.mxu0 %v2445_v0 }
  0xbf   : > { %762 = vmatmul.mubr.bf16.gmra.mxu0 %v2217_v46  ;;  %v2284_v46 = vld [vmem:[%s2610_s30 + $0xe0] sm:$0xff]  }
  0xc0   : > { %771 = vmatprep.mubr.bf16.mxu0 %v2445_v0 }
  0xc7   : > { %772 = vmatmul.mubr.bf16.gmra.mxu0 %v2218_v51 }
  0xc8   : > { %781 = vmatprep.mubr.bf16.mxu0 %v2445_v0 }
  0xcf   : > { %782 = vmatmul.mubr.bf16.gmra.mxu0 %v2219_v56 }
  0xd0   : > { %791 = vmatprep.mubr.bf16.mxu0 %v2445_v0 }
  0xd7   : > { %792 = vmatmul.mubr.bf16.gmra.mxu0 %v2220_v61  ;;  %v2285_v61 = vld [vmem:[%s2610_s30 + $0xe8] sm:$0xff]  }
  0xd8   : > { %801 = vmatprep.mubr.bf16.mxu0 %v2445_v0 }
  0xdf   : > { %802 = vmatmul.mubr.bf16.gmra.mxu0 %v2221_v62 }
  0xe0   : > { %811 = vmatprep.mubr.bf16.mxu0 %v2445_v0 }
  0xe7   : > { %812 = vmatmul.mubr.bf16.gmra.mxu0 %v2222_v63 }
  0xe8   : > { %821 = vmatprep.mubr.bf16.mxu0 %v2445_v0 }
  0xef   : > { %822 = vmatmul.mubr.bf16.gmra.mxu0 %v2223_v1 }
  0xf0   : > { %831 = vmatprep.mubr.bf16.mxu0 %v2445_v0 }
  0xf7   : > { %832 = vmatmul.mubr.bf16.gmra.mxu0 %v2224_v2 }
  0xf8   : > { %841 = vmatprep.mubr.bf16.mxu0 %v2445_v0 }
  0xff   : > { %842 = vmatmul.mubr.bf16.gmra.mxu0 %v2225_v3 }
 0x100   : > { %851 = vmatprep.mubr.bf16.mxu0 %v2445_v0 }
 0x107   : > { %852 = vmatmul.mubr.bf16.gmra.mxu0 %v2226_v4 }
 0x108   : > { %861 = vmatprep.mubr.bf16.mxu0 %v2445_v0 }
 0x10f   : > { %862 = vmatmul.mubr.bf16.gmra.mxu0 %v2227_v5 }
 0x110   : > { %871 = vmatprep.mubr.bf16.mxu0 %v2445_v0 }
 0x117   : > { %872 = vmatmul.mubr.bf16.gmra.mxu0 %v2231_v6 }
 0x118   : > { %881 = vmatprep.mubr.bf16.mxu0 %v2445_v0 }
 0x11f   : > { %882 = vmatmul.mubr.bf16.gmra.mxu0 %v2238_v7 }
 0x120   : > { %891 = vmatprep.mubr.bf16.mxu0 %v2445_v0 }
 0x127   : > { %892 = vmatmul.mubr.bf16.gmra.mxu0 %v2245_v8 }
 0x128   : > { %901 = vmatprep.mubr.bf16.mxu0 %v2445_v0 }
 0x12f   : > { %902 = vmatmul.mubr.bf16.gmra.mxu0 %v2252_v9 }
 0x130   : > { %911 = vmatprep.mubr.bf16.mxu0 %v2445_v0 }
 0x137   : > { %v2670_v11 = vpop.f32.mrf.mxu0  ;;  %912 = vmatmul.mubr.bf16.gmra.mxu0 %v2259_v10 }
 0x138   : > { %921 = vmatprep.mubr.bf16.mxu0 %v2445_v0 }
 0x139   : > { %v2673_v12 = vpop.f32.mrf.mxu0 }
 0x13b   : > { %v2675_v13 = vpop.f32.mrf.mxu0 }
 0x13d   : > { %v2678_v15 = vpop.f32.mrf.mxu0 }
 0x13f   : > { %v2680_v17 = vpop.f32.mrf.mxu0  ;;  %922 = vmatmul.mubr.bf16.gmra.mxu0 %v2266_v14 }
 0x140   : > { %931 = vmatprep.mubr.bf16.mxu0 %v2445_v0 }
 0x141   : > { %v2683_v18 = vpop.f32.mrf.mxu0 }
 0x143   : > { %v2687_v20 = vpop.f32.mrf.mxu0 }
 0x145   : > { %v2690_v22 = vpop.f32.mrf.mxu0 }
 0x147   : > { %v693_v26 = vpop.f32.mrf.mxu0  ;;  %932 = vmatmul.mubr.bf16.gmra.mxu0 %v2273_v21  ;;  %v2286_v21 = vld [vmem:[%s2610_s30 + $0xf0] sm:$0xff]  }
 0x148   : > { %941 = vmatprep.mubr.bf16.mxu0 %v2445_v0  ;;  %v694_v34 = vadd.f32 %v693_v26, %v2700_v28 }
 0x149   : > { %v695_v27 = vpop.f32.mrf.mxu0 }
 0x14a   : > { %v696_v32 = vadd.f32 %v695_v27, %v2704_v29  ;;  %v1000_v41 = vmax.f32 %v694_v34, 0.0 }
 0x14b   : > { %v697_v30 = vpop.f32.mrf.mxu0 }
 0x14c   : > { %v698_v33 = vadd.f32 %v697_v30, %v2700_v28  ;;  %v1001_v39 = vmax.f32 %v696_v32, 0.0 }
 0x14d   : > { %v699_v35 = vpop.f32.mrf.mxu0 }
 0x14e   : > { %v700_v36 = vadd.f32 %v699_v35, %v2704_v29  ;;  %v1002_v37 = vmax.f32 %v698_v33, 0.0  ;;  %v676_v35 = vadd.f32 %v2673_v12, %v2704_v29  ;;  %v678_v12 = vadd.f32 %v2675_v13, %v2700_v28 }
 0x14f   : > { %v703_v38 = vpop.f32.mrf.mxu0  ;;  %942 = vmatmul.mubr.bf16.gmra.mxu0 %v2280_v31  ;;  %v680_v31 = vadd.f32 %v2678_v15, %v2704_v29 }
 0x150   : > { %v1003_v40 = vmax.f32 %v700_v36, 0.0  ;;  %951 = vmatprep.mubr.bf16.mxu0 %v2445_v0  ;;  %v1124_v44 = vpack.c.bf16 %v1002_v37, %v1000_v41  ;;  %v704_v49 = vadd.f32 %v703_v38, %v2700_v28  ;;  %v993_v15 = vmax.f32 %v676_v35, 0.0 }
 0x151   : > { %v705_v42 = vpop.f32.mrf.mxu0 }
 0x152   : > { %v1125_v43 = vpack.c.bf16 %v1003_v40, %v1001_v39  ;;  %v706_v47 = vadd.f32 %v705_v42, %v2704_v29  ;;  %v1004_v56 = vmax.f32 %v704_v49, 0.0  ;;  %v995_v40 = vmax.f32 %v680_v31, 0.0 }
 0x153   : > { %v707_v45 = vpop.f32.mrf.mxu0 }
 0x154   : > { %v708_v48 = vadd.f32 %v707_v45, %v2700_v28  ;;  %1440 = vmatprep.mubr.bf16.mxu1 %v1125_v43  ;;  %v1005_v54 = vmax.f32 %v706_v47, 0.0 }
 0x155   : > { %v709_v50 = vpop.f32.mrf.mxu0  ;;  %1441 = vmatmul.mubr.bf16.vlgmr.msra.gmra.mxu1 %v1124_v44  ;;  %v2287_v44 = vld [vmem:[%s2610_s30 + $0xf8] sm:$0xff]   ;;  %s2374_s30 = scalar_lea.vmem %s2373_s29, 32768 }
 0x156   : > { %v710_v51 = vadd.f32 %v709_v50, %v2704_v29  ;;  %v1006_v52 = vmax.f32 %v708_v48, 0.0  ;;  %v1121_v50 = vpack.c.bf16 %v995_v40, %v993_v15  ;;  %p2376_p12 = scmp.lt.s32.totalorder %s2374_s30, %s2368_s14 }
 0x157   : > { %v713_v53 = vpop.f32.mrf.mxu0  ;;  %952 = vmatmul.mubr.bf16.gmra.mxu0 %v2284_v46 }
 0x158   : > { %v1007_v55 = vmax.f32 %v710_v51, 0.0  ;;  %961 = vmatprep.mubr.bf16.mxu0 %v2445_v0  ;;  %v1126_v59 = vpack.c.bf16 %v1006_v52, %v1004_v56  ;;  %v714_v1 = vadd.f32 %v713_v53, %v2700_v28  ;;  %v674_v51 = vadd.f32 %v2670_v11, %v2700_v28  ;;  %p2377_p7 = por %p2376_p12, %p2375_p6 }
 0x159   : > { %v715_v57 = vpop.f32.mrf.mxu0  ;;  %v994_v56 = vmax.f32 %v678_v12, 0.0 }
 0x15a   : > { %v1127_v58 = vpack.c.bf16 %v1007_v55, %v1005_v54  ;;  %v716_v62 = vadd.f32 %v715_v57, %v2704_v29  ;;  %v1008_v8 = vmax.f32 %v714_v1, 0.0  ;;  %v686_v54 = vadd.f32 %v2683_v18, %v2704_v29  ;;  %p2378_p9 = pnand %p2377_p7, %p2371_p2 }
 0x15b   : > { %v717_v60 = vpop.f32.mrf.mxu0  ;;  %v688_v18 = vadd.f32 %v2687_v20, %v2700_v28 }
 0x15c   : > { %v718_v63 = vadd.f32 %v717_v60, %v2700_v28  ;;  %1450 = vmatprep.mubr.bf16.mxu1 %v1127_v58  ;;  %v1009_v6 = vmax.f32 %v716_v62, 0.0  ;;  %v992_v60 = vmax.f32 %v674_v51, 0.0 }
 0x15d   : > { %v719_v2 = vpop.f32.mrf.mxu0  ;;  %1451 = vmatmul.mubr.bf16.gmra.mxu1 %v1126_v59 }
 0x15e   : > { %v720_v3 = vadd.f32 %v719_v2, %v2704_v29  ;;  %v1010_v4 = vmax.f32 %v718_v63, 0.0  ;;  %v997_v63 = vmax.f32 %v686_v54, 0.0  ;;  %v1120_v2 = vpack.c.bf16 %v994_v56, %v992_v60 }
 0x15f   : > { %v723_v5 = vpop.f32.mrf.mxu0  ;;  %962 = vmatmul.mubr.bf16.gmra.mxu0 %v2285_v61 }
 0x160   : > { %v1011_v7 = vmax.f32 %v720_v3, 0.0  ;;  %971 = vmatprep.mubr.bf16.mxu0 %v2445_v0  ;;  %v1128_v14 = vpack.c.bf16 %v1010_v4, %v1008_v8  ;;  %v724_v27 = vadd.f32 %v723_v5, %v2700_v28 }
 0x161   : > { %v725_v9 = vpop.f32.mrf.mxu0 }
 0x162   : > { %v1129_v10 = vpack.c.bf16 %v1011_v7, %v1009_v6  ;;  %v726_v25 = vadd.f32 %v725_v9, %v2704_v29  ;;  %v1012_v38 = vmax.f32 %v724_v27, 0.0  ;;  %v684_v7 = vadd.f32 %v2680_v17, %v2700_v28 }
 0x163   : > { %v727_v16 = vpop.f32.mrf.mxu0 }
 0x164   : > { %v728_v26 = vadd.f32 %v727_v16, %v2700_v28  ;;  %1460 = vmatprep.mubr.bf16.mxu1 %v1129_v10  ;;  %v1013_v36 = vmax.f32 %v726_v25, 0.0  ;;  %v998_v16 = vmax.f32 %v688_v18, 0.0 }
 0x165   : > { %v729_v30 = vpop.f32.mrf.mxu0  ;;  %1461 = vmatmul.mubr.bf16.gmra.mxu1 %v1128_v14 }
 0x166   : > { %v730_v32 = vadd.f32 %v729_v30, %v2704_v29  ;;  %v1014_v33 = vmax.f32 %v728_v26, 0.0  ;;  %v996_v26 = vmax.f32 %v684_v7, 0.0 }
 0x167   : > { %v733_v34 = vpop.f32.mrf.mxu0  ;;  %972 = vmatmul.mubr.bf16.gmra.mxu0 %v2286_v21 }
 0x168   : > { %v1015_v37 = vmax.f32 %v730_v32, 0.0  ;;  %981 = vmatprep.mubr.bf16.mxu0 %v2445_v0  ;;  %v1130_v42 = vpack.c.bf16 %v1014_v33, %v1012_v38  ;;  %v734_v47 = vadd.f32 %v733_v34, %v2700_v28  ;;  %v690_v0 = vadd.f32 %v2690_v22, %v2704_v29 }
 0x169   : > { %v735_v39 = vpop.f32.mrf.mxu0  ;;  %v1122_v33 = vpack.c.bf16 %v998_v16, %v996_v26 }
 0x16a   : > { %v1131_v41 = vpack.c.bf16 %v1015_v37, %v1013_v36  ;;  %v736_v45 = vadd.f32 %v735_v39, %v2704_v29  ;;  %v1016_v57 = vmax.f32 %v734_v47, 0.0  ;;  %v999_v59 = vmax.f32 %v690_v0, 0.0 }
 0x16b   : > { %v737_v43 = vpop.f32.mrf.mxu0 }
 0x16c   : > { %v738_v46 = vadd.f32 %v737_v43, %v2700_v28  ;;  %1470 = vmatprep.mubr.bf16.mxu1 %v1131_v41  ;;  %v1017_v13 = vmax.f32 %v736_v45, 0.0  ;;  %v1123_v6 = vpack.c.bf16 %v999_v59, %v997_v63 }
 0x16d   : > { %v739_v48 = vpop.f32.mrf.mxu0  ;;  %1471 = vmatmul.mubr.bf16.gmra.mxu1 %v1130_v42 }
 0x16e   : > { %v740_v49 = vadd.f32 %v739_v48, %v2704_v29  ;;  %v1018_v52 = vmax.f32 %v738_v46, 0.0 }
 0x16f   : > { %v743_v53 = vpop.f32.mrf.mxu0  ;;  %982 = vmatmul.mubr.bf16.gmra.mxu0 %v2287_v44 }
 0x170   : > { %v1019_v55 = vmax.f32 %v740_v49, 0.0  ;;  %1420 = vmatprep.mubr.bf16.mxu0 %v1121_v50  ;;  %v1132_v61 = vpack.c.bf16 %v1018_v52, %v1016_v57  ;;  %v744_v3 = vadd.f32 %v743_v53, %v2700_v28 }
 0x171   : > { %v745_v58 = vpop.f32.mrf.mxu0 }
 0x172   : > { %v1133_v22 = vpack.c.bf16 %v1019_v55, %v1017_v13  ;;  %v746_v11 = vadd.f32 %v745_v58, %v2704_v29  ;;  %v1020_v21 = vmax.f32 %v744_v3, 0.0 }
 0x173   : > { %v747_v62 = vpop.f32.mrf.mxu0 }
 0x174   : > { %v748_v1 = vadd.f32 %v747_v62, %v2700_v28  ;;  %1480 = vmatprep.mubr.bf16.mxu1 %v1133_v22  ;;  %v1021_v10 = vmax.f32 %v746_v11, 0.0 }
 0x175   : > { %v749_v4 = vpop.f32.mrf.mxu0  ;;  %1481 = vmatmul.mubr.bf16.gmra.mxu1 %v1132_v61 }
 0x176   : > { %v750_v5 = vadd.f32 %v749_v4, %v2704_v29  ;;  %v1022_v8 = vmax.f32 %v748_v1, 0.0 }
 0x177   : > { %v753_v9 = vpop.f32.mrf.mxu0  ;;  %1421 = vmatmul.mubr.bf16.vlgmr.msra.gmra.mxu0 %v1120_v2 }
 0x178   : > { %v1023_v14 = vmax.f32 %v750_v5, 0.0  ;;  %1430 = vmatprep.mubr.bf16.mxu0 %v1123_v6  ;;  %v1134_v27 = vpack.c.bf16 %v1022_v8, %v1020_v21  ;;  %v754_v17 = vadd.f32 %v753_v9, %v2700_v28 }
 0x179   : > { %v755_v25 = vpop.f32.mrf.mxu0 }
 0x17a   : > { %v1135_v20 = vpack.c.bf16 %v1023_v14, %v1021_v10  ;;  %v756_v31 = vadd.f32 %v755_v25, %v2704_v29  ;;  %v1024_v40 = vmax.f32 %v754_v17, 0.0 }
 0x17b   : > { %v757_v30 = vpop.f32.mrf.mxu0 }
 0x17c   : > { %v758_v32 = vadd.f32 %v757_v30, %v2700_v28  ;;  %1490 = vmatprep.mubr.bf16.mxu1 %v1135_v20  ;;  %v1025_v38 = vmax.f32 %v756_v31, 0.0 }
 0x17d   : > { %v759_v34 = vpop.f32.mrf.mxu0  ;;  %1491 = vmatmul.mubr.bf16.gmra.mxu1 %v1134_v27 }
 0x17e   : > { %v760_v35 = vadd.f32 %v759_v34, %v2704_v29  ;;  %v1026_v36 = vmax.f32 %v758_v32, 0.0 }
 0x17f   : > { %v763_v37 = vpop.f32.mrf.mxu0  ;;  %1431 = vmatmul.mubr.bf16.gmra.mxu0 %v1122_v33 }
 0x180   : > { %v1027_v39 = vmax.f32 %v760_v35, 0.0  ;;  %v1136_v43 = vpack.c.bf16 %v1026_v36, %v1024_v40  ;;  %v764_v46 = vadd.f32 %v763_v37, %v2700_v28 }
 0x181   : > { %v765_v41 = vpop.f32.mrf.mxu0 }
 0x182   : > { %v1137_v42 = vpack.c.bf16 %v1027_v39, %v1025_v38  ;;  %v766_v15 = vadd.f32 %v765_v41, %v2704_v29  ;;  %v1028_v51 = vmax.f32 %v764_v46, 0.0 }
 0x183   : > { %v767_v44 = vpop.f32.mrf.mxu0 }
 0x184   : > { %v768_v45 = vadd.f32 %v767_v44, %v2700_v28  ;;  %1500 = vmatprep.mubr.bf16.mxu1 %v1137_v42  ;;  %v1029_v49 = vmax.f32 %v766_v15, 0.0 }
 0x185   : > { %v769_v12 = vpop.f32.mrf.mxu0  ;;  %1501 = vmatmul.mubr.bf16.gmra.mxu1 %v1136_v43 }
 0x186   : > { %v770_v47 = vadd.f32 %v769_v12, %v2704_v29  ;;  %v1030_v48 = vmax.f32 %v768_v45, 0.0 }
 0x187   : > { %v773_v0 = vpop.f32.mrf.mxu0 }
 0x188   : > { %v1031_v50 = vmax.f32 %v770_v47, 0.0  ;;  %v1138_v54 = vpack.c.bf16 %v1030_v48, %v1028_v51  ;;  %v774_v57 = vadd.f32 %v773_v0, %v2700_v28 }
 0x189   : > { %v775_v52 = vpop.f32.mrf.mxu0 }
 0x18a   : > { %v1139_v53 = vpack.c.bf16 %v1031_v50, %v1029_v49  ;;  %v776_v55 = vadd.f32 %v775_v52, %v2704_v29  ;;  %v1032_v63 = vmax.f32 %v774_v57, 0.0 }
 0x18b   : > { %v777_v13 = vpop.f32.mrf.mxu0 }
 0x18c   : > { %v778_v56 = vadd.f32 %v777_v13, %v2700_v28  ;;  %1510 = vmatprep.mubr.bf16.mxu1 %v1139_v53  ;;  %v1033_v61 = vmax.f32 %v776_v55, 0.0 }
 0x18d   : > { %v779_v58 = vpop.f32.mrf.mxu0  ;;  %1511 = vmatmul.mubr.bf16.gmra.mxu1 %v1138_v54 }
 0x18e   : > { %v780_v59 = vadd.f32 %v779_v58, %v2704_v29  ;;  %v1034_v22 = vmax.f32 %v778_v56, 0.0 }
 0x18f   : > { %v783_v60 = vpop.f32.mrf.mxu0 }
 0x190   : > { %v1035_v62 = vmax.f32 %v780_v59, 0.0  ;;  %v1140_v2 = vpack.c.bf16 %v1034_v22, %v1032_v63  ;;  %v784_v5 = vadd.f32 %v783_v60, %v2700_v28 }
 0x191   : > { %v785_v11 = vpop.f32.mrf.mxu0 }
 0x192   : > { %v1141_v1 = vpack.c.bf16 %v1035_v62, %v1033_v61  ;;  %v786_v3 = vadd.f32 %v785_v11, %v2704_v29  ;;  %v1036_v16 = vmax.f32 %v784_v5, 0.0 }
 0x193   : > { %v787_v18 = vpop.f32.mrf.mxu0 }
 0x194   : > { %v788_v4 = vadd.f32 %v787_v18, %v2700_v28  ;;  %1520 = vmatprep.mubr.bf16.mxu1 %v1141_v1  ;;  %v1037_v10 = vmax.f32 %v786_v3, 0.0 }
 0x195   : > { %v789_v6 = vpop.f32.mrf.mxu0  ;;  %1521 = vmatmul.mubr.bf16.gmra.mxu1 %v1140_v2 }
 0x196   : > { %v790_v7 = vadd.f32 %v789_v6, %v2704_v29  ;;  %v1038_v8 = vmax.f32 %v788_v4, 0.0 }
 0x197   : > { %v793_v9 = vpop.f32.mrf.mxu0 }
 0x198   : > { %v1039_v14 = vmax.f32 %v790_v7, 0.0  ;;  %v1142_v20 = vpack.c.bf16 %v1038_v8, %v1036_v16  ;;  %v794_v31 = vadd.f32 %v793_v9, %v2700_v28 }
 0x199   : > { %v795_v21 = vpop.f32.mrf.mxu0 }
 0x19a   : > { %v1143_v25 = vpack.c.bf16 %v1039_v14, %v1037_v10  ;;  %v796_v27 = vadd.f32 %v795_v21, %v2704_v29  ;;  %v1040_v37 = vmax.f32 %v794_v31, 0.0 }
 0x19b   : > { %v797_v26 = vpop.f32.mrf.mxu0 }
 0x19c   : > { %v798_v30 = vadd.f32 %v797_v26, %v2700_v28  ;;  %1530 = vmatprep.mubr.bf16.mxu1 %v1143_v25  ;;  %v1041_v35 = vmax.f32 %v796_v27, 0.0 }
 0x19d   : > { %v799_v32 = vpop.f32.mrf.mxu0  ;;  %1531 = vmatmul.mubr.bf16.gmra.mxu1 %v1142_v20 }
 0x19e   : > { %v800_v33 = vadd.f32 %v799_v32, %v2704_v29  ;;  %v1042_v17 = vmax.f32 %v798_v30, 0.0 }
 0x19f   : > { %v803_v34 = vpop.f32.mrf.mxu0 }
 0x1a0   : > { %v1043_v36 = vmax.f32 %v800_v33, 0.0  ;;  %v1144_v40 = vpack.c.bf16 %v1042_v17, %v1040_v37  ;;  %v804_v44 = vadd.f32 %v803_v34, %v2700_v28 }
 0x1a1   : > { %v805_v38 = vpop.f32.mrf.mxu0 }
 0x1a2   : > { %v1145_v39 = vpack.c.bf16 %v1043_v36, %v1041_v35  ;;  %v806_v42 = vadd.f32 %v805_v38, %v2704_v29  ;;  %v1044_v0 = vmax.f32 %v804_v44, 0.0 }
 0x1a3   : > { %v807_v41 = vpop.f32.mrf.mxu0 }
 0x1a4   : > { %v808_v43 = vadd.f32 %v807_v41, %v2700_v28  ;;  %1540 = vmatprep.mubr.bf16.mxu1 %v1145_v39  ;;  %v1045_v47 = vmax.f32 %v806_v42, 0.0 }
 0x1a5   : > { %v809_v15 = vpop.f32.mrf.mxu0  ;;  %1541 = vmatmul.mubr.bf16.gmra.mxu1 %v1144_v40 }
 0x1a6   : > { %v810_v45 = vadd.f32 %v809_v15, %v2704_v29  ;;  %v1046_v46 = vmax.f32 %v808_v43, 0.0 }
 0x1a7   : > { %v813_v12 = vpop.f32.mrf.mxu0 }
 0x1a8   : > { %v1047_v48 = vmax.f32 %v810_v45, 0.0  ;;  %v1146_v51 = vpack.c.bf16 %v1046_v46, %v1044_v0  ;;  %v814_v13 = vadd.f32 %v813_v12, %v2700_v28 }
 0x1a9   : > { %v815_v49 = vpop.f32.mrf.mxu0 }
 0x1aa   : > { %v1147_v50 = vpack.c.bf16 %v1047_v48, %v1045_v47  ;;  %v816_v53 = vadd.f32 %v815_v49, %v2704_v29  ;;  %v1048_v60 = vmax.f32 %v814_v13, 0.0 }
 0x1ab   : > { %v817_v52 = vpop.f32.mrf.mxu0 }
 0x1ac   : > { %v818_v54 = vadd.f32 %v817_v52, %v2700_v28  ;;  %1550 = vmatprep.mubr.bf16.mxu1 %v1147_v50  ;;  %v1049_v59 = vmax.f32 %v816_v53, 0.0 }
 0x1ad   : > { %v819_v55 = vpop.f32.mrf.mxu0  ;;  %1551 = vmatmul.mubr.bf16.gmra.mxu1 %v1146_v51 }
 0x1ae   : > { %v820_v56 = vadd.f32 %v819_v55, %v2704_v29  ;;  %v1050_v57 = vmax.f32 %v818_v54, 0.0 }
 0x1af   : > { %v823_v58 = vpop.f32.mrf.mxu0 }
 0x1b0   : > { %v1051_v22 = vmax.f32 %v820_v56, 0.0  ;;  %v1148_v63 = vpack.c.bf16 %v1050_v57, %v1048_v60  ;;  %v824_v18 = vadd.f32 %v823_v58, %v2700_v28 }
 0x1b1   : > { %v825_v61 = vpop.f32.mrf.mxu0 }
 0x1b2   : > { %v1149_v62 = vpack.c.bf16 %v1051_v22, %v1049_v59  ;;  %v826_v1 = vadd.f32 %v825_v61, %v2704_v29  ;;  %v1052_v9 = vmax.f32 %v824_v18, 0.0 }
 0x1b3   : > { %v827_v11 = vpop.f32.mrf.mxu0 }
 0x1b4   : > { %v828_v2 = vadd.f32 %v827_v11, %v2700_v28  ;;  %1560 = vmatprep.mubr.bf16.mxu1 %v1149_v62  ;;  %v1053_v7 = vmax.f32 %v826_v1, 0.0 }
 0x1b5   : > { %v829_v3 = vpop.f32.mrf.mxu0  ;;  %1561 = vmatmul.mubr.bf16.gmra.mxu1 %v1148_v63 }
 0x1b6   : > { %v830_v4 = vadd.f32 %v829_v3, %v2704_v29  ;;  %v1054_v5 = vmax.f32 %v828_v2, 0.0 }
 0x1b7   : > { %v833_v6 = vpop.f32.mrf.mxu0 }
 0x1b8   : > { %v1055_v8 = vmax.f32 %v830_v4, 0.0  ;;  %v1150_v16 = vpack.c.bf16 %v1054_v5, %v1052_v9  ;;  %v834_v26 = vadd.f32 %v833_v6, %v2700_v28 }
 0x1b9   : > { %v835_v10 = vpop.f32.mrf.mxu0 }
 0x1ba   : > { %v1151_v14 = vpack.c.bf16 %v1055_v8, %v1053_v7  ;;  %v836_v25 = vadd.f32 %v835_v10, %v2704_v29  ;;  %v1056_v34 = vmax.f32 %v834_v26, 0.0 }
 0x1bb   : > { %v837_v21 = vpop.f32.mrf.mxu0 }
 0x1bc   : > { %v838_v20 = vadd.f32 %v837_v21, %v2700_v28  ;;  %1570 = vmatprep.mubr.bf16.mxu1 %v1151_v14  ;;  %v1057_v33 = vmax.f32 %v836_v25, 0.0 }
 0x1bd   : > { %v839_v27 = vpop.f32.mrf.mxu0  ;;  %1571 = vmatmul.mubr.bf16.gmra.mxu1 %v1150_v16 }
 0x1be   : > { %v840_v30 = vadd.f32 %v839_v27, %v2704_v29  ;;  %v1058_v31 = vmax.f32 %v838_v20, 0.0 }
 0x1bf   : > { %v843_v32 = vpop.f32.mrf.mxu0 }
 0x1c0   : > { %v1059_v17 = vmax.f32 %v840_v30, 0.0  ;;  %v1152_v37 = vpack.c.bf16 %v1058_v31, %v1056_v34  ;;  %v844_v41 = vadd.f32 %v843_v32, %v2700_v28 }
 0x1c1   : > { %v845_v35 = vpop.f32.mrf.mxu0 }
 0x1c2   : > { %v1153_v36 = vpack.c.bf16 %v1059_v17, %v1057_v33  ;;  %v846_v39 = vadd.f32 %v845_v35, %v2704_v29  ;;  %v1060_v12 = vmax.f32 %v844_v41, 0.0 }
 0x1c3   : > { %v847_v38 = vpop.f32.mrf.mxu0 }
 0x1c4   : > { %v848_v40 = vadd.f32 %v847_v38, %v2700_v28  ;;  %1580 = vmatprep.mubr.bf16.mxu1 %v1153_v36  ;;  %v1061_v45 = vmax.f32 %v846_v39, 0.0 }
 0x1c5   : > { %v849_v42 = vpop.f32.mrf.mxu0  ;;  %1581 = vmatmul.mubr.bf16.gmra.mxu1 %v1152_v37 }
 0x1c6   : > { %v850_v43 = vadd.f32 %v849_v42, %v2704_v29  ;;  %v1062_v44 = vmax.f32 %v848_v40, 0.0 }
 0x1c7   : > { %v853_v15 = vpop.f32.mrf.mxu0 }
 0x1c8   : > { %v1063_v46 = vmax.f32 %v850_v43, 0.0  ;;  %v1154_v0 = vpack.c.bf16 %v1062_v44, %v1060_v12  ;;  %v854_v52 = vadd.f32 %v853_v15, %v2700_v28 }
 0x1c9   : > { %v855_v47 = vpop.f32.mrf.mxu0 }
 0x1ca   : > { %v1155_v48 = vpack.c.bf16 %v1063_v46, %v1061_v45  ;;  %v856_v50 = vadd.f32 %v855_v47, %v2704_v29  ;;  %v1064_v58 = vmax.f32 %v854_v52, 0.0 }
 0x1cb   : > { %v857_v49 = vpop.f32.mrf.mxu0 }
 0x1cc   : > { %v858_v51 = vadd.f32 %v857_v49, %v2700_v28  ;;  %1590 = vmatprep.mubr.bf16.mxu1 %v1155_v48  ;;  %v1065_v56 = vmax.f32 %v856_v50, 0.0 }
 0x1cd   : > { %v859_v53 = vpop.f32.mrf.mxu0  ;;  %1591 = vmatmul.mubr.bf16.gmra.mxu1 %v1154_v0 }
 0x1ce   : > { %v860_v54 = vadd.f32 %v859_v53, %v2704_v29  ;;  %v1066_v13 = vmax.f32 %v858_v51, 0.0 }
 0x1cf   : > { %v863_v55 = vpop.f32.mrf.mxu0 }
 0x1d0   : > { %v1067_v57 = vmax.f32 %v860_v54, 0.0  ;;  %v1156_v60 = vpack.c.bf16 %v1066_v13, %v1064_v58  ;;  %v864_v11 = vadd.f32 %v863_v55, %v2700_v28 }
 0x1d1   : > { %v865_v59 = vpop.f32.mrf.mxu0 }
 0x1d2   : > { %v1157_v22 = vpack.c.bf16 %v1067_v57, %v1065_v56  ;;  %v866_v62 = vadd.f32 %v865_v59, %v2704_v29  ;;  %v1068_v6 = vmax.f32 %v864_v11, 0.0 }
 0x1d3   : > { %v867_v61 = vpop.f32.mrf.mxu0 }
 0x1d4   : > { %v868_v63 = vadd.f32 %v867_v61, %v2700_v28  ;;  %1600 = vmatprep.mubr.bf16.mxu1 %v1157_v22  ;;  %v1069_v4 = vmax.f32 %v866_v62, 0.0 }
 0x1d5   : > { %v869_v1 = vpop.f32.mrf.mxu0  ;;  %1601 = vmatmul.mubr.bf16.gmra.mxu1 %v1156_v60 }
 0x1d6   : > { %v870_v2 = vadd.f32 %v869_v1, %v2704_v29  ;;  %v1070_v18 = vmax.f32 %v868_v63, 0.0 }
 0x1d7   : > { %v873_v3 = vpop.f32.mrf.mxu0 }
 0x1d8   : > { %v1071_v5 = vmax.f32 %v870_v2, 0.0  ;;  %v1158_v9 = vpack.c.bf16 %v1070_v18, %v1068_v6  ;;  %v874_v21 = vadd.f32 %v873_v3, %v2700_v28 }
 0x1d9   : > { %v875_v7 = vpop.f32.mrf.mxu0 }
 0x1da   : > { %v1159_v8 = vpack.c.bf16 %v1071_v5, %v1069_v4  ;;  %v876_v14 = vadd.f32 %v875_v7, %v2704_v29  ;;  %v1072_v32 = vmax.f32 %v874_v21, 0.0 }
 0x1db   : > { %v877_v10 = vpop.f32.mrf.mxu0 }
 0x1dc   : > { %v878_v16 = vadd.f32 %v877_v10, %v2700_v28  ;;  %1610 = vmatprep.mubr.bf16.mxu1 %v1159_v8  ;;  %v1073_v30 = vmax.f32 %v876_v14, 0.0 }
 0x1dd   : > { %v879_v25 = vpop.f32.mrf.mxu0  ;;  %1611 = vmatmul.mubr.bf16.gmra.mxu1 %v1158_v9 }
 0x1de   : > { %v880_v20 = vadd.f32 %v879_v25, %v2704_v29  ;;  %v1074_v26 = vmax.f32 %v878_v16, 0.0 }
 0x1df   : > { %v883_v27 = vpop.f32.mrf.mxu0 }
 0x1e0   : > { %v1075_v31 = vmax.f32 %v880_v20, 0.0  ;;  %v1160_v34 = vpack.c.bf16 %v1074_v26, %v1072_v32  ;;  %v884_v38 = vadd.f32 %v883_v27, %v2700_v28 }
 0x1e1   : > { %v885_v33 = vpop.f32.mrf.mxu0 }
 0x1e2   : > { %v1161_v17 = vpack.c.bf16 %v1075_v31, %v1073_v30  ;;  %v886_v36 = vadd.f32 %v885_v33, %v2704_v29  ;;  %v1076_v15 = vmax.f32 %v884_v38, 0.0 }
 0x1e3   : > { %v887_v35 = vpop.f32.mrf.mxu0 }
 0x1e4   : > { %v888_v37 = vadd.f32 %v887_v35, %v2700_v28  ;;  %1620 = vmatprep.mubr.bf16.mxu1 %v1161_v17  ;;  %v1077_v43 = vmax.f32 %v886_v36, 0.0 }
 0x1e5   : > { %v889_v39 = vpop.f32.mrf.mxu0  ;;  %1621 = vmatmul.mubr.bf16.gmra.mxu1 %v1160_v34 }
 0x1e6   : > { %v890_v40 = vadd.f32 %v889_v39, %v2704_v29  ;;  %v1078_v41 = vmax.f32 %v888_v37, 0.0 }
 0x1e7   : > { %v893_v42 = vpop.f32.mrf.mxu0 }
 0x1e8   : > { %v1079_v44 = vmax.f32 %v890_v40, 0.0  ;;  %v1162_v12 = vpack.c.bf16 %v1078_v41, %v1076_v15  ;;  %v894_v49 = vadd.f32 %v893_v42, %v2700_v28 }
 0x1e9   : > { %v895_v45 = vpop.f32.mrf.mxu0 }
 0x1ea   : > { %v1163_v46 = vpack.c.bf16 %v1079_v44, %v1077_v43  ;;  %v896_v48 = vadd.f32 %v895_v45, %v2704_v29  ;;  %v1080_v55 = vmax.f32 %v894_v49, 0.0 }
 0x1eb   : > { %v897_v47 = vpop.f32.mrf.mxu0 }
 0x1ec   : > { %v898_v0 = vadd.f32 %v897_v47, %v2700_v28  ;;  %1630 = vmatprep.mubr.bf16.mxu1 %v1163_v46  ;;  %v1081_v54 = vmax.f32 %v896_v48, 0.0 }
 0x1ed   : > { %v899_v50 = vpop.f32.mrf.mxu0  ;;  %1631 = vmatmul.mubr.bf16.gmra.mxu1 %v1162_v12 }
 0x1ee   : > { %v900_v51 = vadd.f32 %v899_v50, %v2704_v29  ;;  %v1082_v52 = vmax.f32 %v898_v0, 0.0 }
 0x1ef   : > { %v903_v53 = vpop.f32.mrf.mxu0 }
 0x1f0   : > { %v1083_v13 = vmax.f32 %v900_v51, 0.0  ;;  %v1164_v58 = vpack.c.bf16 %v1082_v52, %v1080_v55  ;;  %v904_v61 = vadd.f32 %v903_v53, %v2700_v28  ;;  %v1216_v51 = vld [vmem:[%s3175_s4] sm:$0x3] }
 0x1f1   : > { %v905_v56 = vpop.f32.mrf.mxu0 }
 0x1f2   : > { %v1165_v57 = vpack.c.bf16 %v1083_v13, %v1081_v54  ;;  %v906_v22 = vadd.f32 %v905_v56, %v2704_v29  ;;  %v1084_v3 = vmax.f32 %v904_v61, 0.0  ;;  %v2837_v56 = vrot.slane %v1216_v51, %v359_v23 }
 0x1f3   : > { %v907_v59 = vpop.f32.mrf.mxu0 }
 0x1f4   : > { %v908_v60 = vadd.f32 %v907_v59, %v2700_v28  ;;  %1640 = vmatprep.mubr.bf16.mxu1 %v1165_v57  ;;  %v1085_v2 = vmax.f32 %v906_v22, 0.0 }
 0x1f5   : > { %v909_v62 = vpop.f32.mrf.mxu0  ;;  %1641 = vmatmul.mubr.bf16.gmra.mxu1 %v1164_v58 }
 0x1f6   : > { %v910_v63 = vadd.f32 %v909_v62, %v2704_v29  ;;  %v1086_v11 = vmax.f32 %v908_v60, 0.0  ;;  %v2843_v60 = vrot.slane %v1216_v51, %v363_v24 }
 0x1f7   : > { %v913_v1 = vpop.f32.mrf.mxu0 }
 0x1f8   : > { %v1087_v18 = vmax.f32 %v910_v63, 0.0  ;;  %v1166_v6 = vpack.c.bf16 %v1086_v11, %v1084_v3  ;;  %v914_v10 = vadd.f32 %v913_v1, %v2700_v28 }
 0x1f9   : > { %v915_v4 = vpop.f32.mrf.mxu0 }
 0x1fa   : > { %v1167_v5 = vpack.c.bf16 %v1087_v18, %v1085_v2  ;;  %v916_v8 = vadd.f32 %v915_v4, %v2704_v29  ;;  %v1088_v27 = vmax.f32 %v914_v10, 0.0 }
 0x1fb   : > { %v917_v7 = vpop.f32.mrf.mxu0 }
 0x1fc   : > { %v918_v9 = vadd.f32 %v917_v7, %v2700_v28  ;;  %1650 = vmatprep.mubr.bf16.mxu1 %v1167_v5  ;;  %v1089_v20 = vmax.f32 %v916_v8, 0.0 }
 0x1fd   : > { %v919_v14 = vpop.f32.mrf.mxu0  ;;  %1651 = vmatmul.mubr.bf16.gmra.mxu1 %v1166_v6 }
 0x1fe   : > { %v920_v16 = vadd.f32 %v919_v14, %v2704_v29  ;;  %v1090_v21 = vmax.f32 %v918_v9, 0.0 }
 0x1ff   : > { %v923_v25 = vpop.f32.mrf.mxu0 }
 0x200   : > { %v1091_v26 = vmax.f32 %v920_v16, 0.0  ;;  %v1168_v32 = vpack.c.bf16 %v1090_v21, %v1088_v27  ;;  %v924_v35 = vadd.f32 %v923_v25, %v2700_v28 }
 0x201   : > { %v925_v30 = vpop.f32.mrf.mxu0 }
 0x202   : > { %v1169_v31 = vpack.c.bf16 %v1091_v26, %v1089_v20  ;;  %v926_v17 = vadd.f32 %v925_v30, %v2704_v29  ;;  %v1092_v42 = vmax.f32 %v924_v35, 0.0 }
 0x203   : > { %v927_v33 = vpop.f32.mrf.mxu0 }
 0x204   : > { %v928_v34 = vadd.f32 %v927_v33, %v2700_v28  ;;  %1660 = vmatprep.mubr.bf16.mxu1 %v1169_v31  ;;  %v1093_v40 = vmax.f32 %v926_v17, 0.0 }
 0x205   : > { %v929_v36 = vpop.f32.mrf.mxu0  ;;  %1661 = vmatmul.mubr.bf16.gmra.mxu1 %v1168_v32 }
 0x206   : > { %v930_v37 = vadd.f32 %v929_v36, %v2704_v29  ;;  %v1094_v38 = vmax.f32 %v928_v34, 0.0 }
 0x207   : > { %v933_v39 = vpop.f32.mrf.mxu0 }
 0x208   : > { %v1095_v41 = vmax.f32 %v930_v37, 0.0  ;;  %v1170_v15 = vpack.c.bf16 %v1094_v38, %v1092_v42  ;;  %v934_v47 = vadd.f32 %v933_v39, %v2700_v28 }
 0x209   : > { %v935_v43 = vpop.f32.mrf.mxu0 }
 0x20a   : > { %v1171_v44 = vpack.c.bf16 %v1095_v41, %v1093_v40  ;;  %v936_v46 = vadd.f32 %v935_v43, %v2704_v29  ;;  %v1096_v54 = vmax.f32 %v934_v47, 0.0 }
 0x20b   : > { %v937_v45 = vpop.f32.mrf.mxu0 }
 0x20c   : > { %v938_v12 = vadd.f32 %v937_v45, %v2700_v28  ;;  %1670 = vmatprep.mubr.bf16.mxu1 %v1171_v44  ;;  %v1097_v52 = vmax.f32 %v936_v46, 0.0 }
 0x20d   : > { %v939_v48 = vpop.f32.mrf.mxu0  ;;  %1671 = vmatmul.mubr.bf16.gmra.mxu1 %v1170_v15 }
 0x20e   : > { %v940_v0 = vadd.f32 %v939_v48, %v2704_v29  ;;  %v1098_v49 = vmax.f32 %v938_v12, 0.0 }
 0x20f   : > { %v943_v50 = vpop.f32.mrf.mxu0 }
 0x210   : > { %v1099_v53 = vmax.f32 %v940_v0, 0.0  ;;  %v1172_v57 = vpack.c.bf16 %v1098_v49, %v1096_v54  ;;  %v944_v61 = vadd.f32 %v943_v50, %v2700_v28 }
 0x211   : > { %v945_v13 = vpop.f32.mrf.mxu0 }
 0x212   : > { %v1173_v55 = vpack.c.bf16 %v1099_v53, %v1097_v52  ;;  %v946_v59 = vadd.f32 %v945_v13, %v2704_v29  ;;  %v1100_v24 = vmax.f32 %v944_v61, 0.0 }
 0x213   : > { %v947_v58 = vpop.f32.mrf.mxu0 }
 0x214   : > { %v948_v22 = vadd.f32 %v947_v58, %v2700_v28  ;;  %1680 = vmatprep.mubr.bf16.mxu1 %v1173_v55  ;;  %v1101_v3 = vmax.f32 %v946_v59, 0.0 }
 0x215   : > { %v949_v62 = vpop.f32.mrf.mxu0  ;;  %v1442_v63 = vpop.f32.mrf.mxu1  ;;  %1681 = vmatmul.mubr.bf16.gmra.mxu1 %v1172_v57 }
 0x216   : > { %v950_v11 = vadd.f32 %v949_v62, %v2704_v29  ;;  %v1443_v23 = vadd.f32 %v1442_v63, %v2837_v56  ;;  %v1102_v1 = vmax.f32 %v948_v22, 0.0 }
 0x217   : > { %v953_v2 = vpop.f32.mrf.mxu0  ;;  %v1444_v18 = vpop.f32.mrf.mxu1 }
 0x218   : > { %v1103_v4 = vmax.f32 %v950_v11, 0.0  ;;  %1749 = vst [vmem:[%s2848_s12 + $0x40] sm:$0xff] %v1443_v23  ;;  %v1445_v19 = vadd.f32 %v1444_v18, %v2843_v60  ;;  %v1174_v9 = vpack.c.bf16 %v1102_v1, %v1100_v24  ;;  %v954_v20 = vadd.f32 %v953_v2, %v2700_v28 }
 0x219   : > { %v955_v5 = vpop.f32.mrf.mxu0  ;;  %v1446_v6 = vpop.f32.mrf.mxu1 }
 0x21a   : > { %v1175_v7 = vpack.c.bf16 %v1103_v4, %v1101_v3  ;;  %1750 = vst [vmem:[%s2848_s12 + $0x48] sm:$0xff] %v1445_v19  ;;  %v1447_v8 = vadd.f32 %v1446_v6, %v2837_v56  ;;  %v956_v16 = vadd.f32 %v955_v5, %v2704_v29  ;;  %v1104_v37 = vmax.f32 %v954_v20, 0.0 }
 0x21b   : > { %v957_v10 = vpop.f32.mrf.mxu0  ;;  %v1448_v14 = vpop.f32.mrf.mxu1 }
 0x21c   : > { %1751 = vst [vmem:[%s2848_s12 + $0x50] sm:$0xff] %v1447_v8  ;;  %v958_v21 = vadd.f32 %v957_v10, %v2700_v28  ;;  %v1449_v25 = vadd.f32 %v1448_v14, %v2843_v60  ;;  %1690 = vmatprep.mubr.bf16.mxu1 %v1175_v7  ;;  %v1105_v34 = vmax.f32 %v956_v16, 0.0 }
 0x21d   : > { %v959_v26 = vpop.f32.mrf.mxu0  ;;  %v1452_v27 = vpop.f32.mrf.mxu1  ;;  %1691 = vmatmul.mubr.bf16.gmra.mxu1 %v1174_v9 }
 0x21e   : > { %1752 = vst [vmem:[%s2848_s12 + $0x58] sm:$0xff] %v1449_v25  ;;  %v960_v30 = vadd.f32 %v959_v26, %v2704_v29  ;;  %v1453_v31 = vadd.f32 %v1452_v27, %v2837_v56  ;;  %v1106_v32 = vmax.f32 %v958_v21, 0.0 }
 0x21f   : > { %v963_v33 = vpop.f32.mrf.mxu0  ;;  %v1454_v17 = vpop.f32.mrf.mxu1 }
 0x220   : > { %v1107_v35 = vmax.f32 %v960_v30, 0.0  ;;  %1753 = vst [vmem:[%s2848_s12 + $0x60] sm:$0xff] %v1453_v31  ;;  %v1455_v36 = vadd.f32 %v1454_v17, %v2843_v60  ;;  %v1176_v42 = vpack.c.bf16 %v1106_v32, %v1104_v37  ;;  %v964_v12 = vadd.f32 %v963_v33, %v2700_v28 }
 0x221   : > { %v965_v38 = vpop.f32.mrf.mxu0  ;;  %v1456_v39 = vpop.f32.mrf.mxu1 }
 0x222   : > { %v1177_v40 = vpack.c.bf16 %v1107_v35, %v1105_v34  ;;  %1754 = vst [vmem:[%s2848_s12 + $0x68] sm:$0xff] %v1455_v36  ;;  %v1457_v41 = vadd.f32 %v1456_v39, %v2837_v56  ;;  %v966_v15 = vadd.f32 %v965_v38, %v2704_v29  ;;  %v1108_v55 = vmax.f32 %v964_v12, 0.0 }
 0x223   : > { %v967_v43 = vpop.f32.mrf.mxu0  ;;  %v1458_v44 = vpop.f32.mrf.mxu1 }
 0x224   : > { %1755 = vst [vmem:[%s2848_s12 + $0x70] sm:$0xff] %v1457_v41  ;;  %v968_v45 = vadd.f32 %v967_v43, %v2700_v28  ;;  %v1459_v46 = vadd.f32 %v1458_v44, %v2843_v60  ;;  %1700 = vmatprep.mubr.bf16.mxu1 %v1177_v40  ;;  %v1109_v53 = vmax.f32 %v966_v15, 0.0 }
 0x225   : > { %v969_v47 = vpop.f32.mrf.mxu0  ;;  %v1462_v48 = vpop.f32.mrf.mxu1  ;;  %1701 = vmatmul.mubr.bf16.gmra.mxu1 %v1176_v42 }
 0x226   : > { %1756 = vst [vmem:[%s2848_s12 + $0x78] sm:$0xff] %v1459_v46  ;;  %v970_v0 = vadd.f32 %v969_v47, %v2704_v29  ;;  %v1463_v49 = vadd.f32 %v1462_v48, %v2837_v56  ;;  %v1110_v50 = vmax.f32 %v968_v45, 0.0 }
 0x227   : > { %v973_v51 = vpop.f32.mrf.mxu0  ;;  %v1464_v52 = vpop.f32.mrf.mxu1 }
 0x228   : > { %v1111_v54 = vmax.f32 %v970_v0, 0.0  ;;  %1757 = vst [vmem:[%s2848_s12 + $0x80] sm:$0xff] %v1463_v49  ;;  %v1465_v13 = vadd.f32 %v1464_v52, %v2843_v60  ;;  %v1178_v61 = vpack.c.bf16 %v1110_v50, %v1108_v55  ;;  %v974_v2 = vadd.f32 %v973_v51, %v2700_v28 }
 0x229   : > { %v975_v57 = vpop.f32.mrf.mxu0  ;;  %v1466_v58 = vpop.f32.mrf.mxu1 }
 0x22a   : > { %v1179_v59 = vpack.c.bf16 %v1111_v54, %v1109_v53  ;;  %1758 = vst [vmem:[%s2848_s12 + $0x88] sm:$0xff] %v1465_v13  ;;  %v1467_v22 = vadd.f32 %v1466_v58, %v2837_v56  ;;  %v976_v11 = vadd.f32 %v975_v57, %v2704_v29  ;;  %v1112_v10 = vmax.f32 %v974_v2, 0.0 }
 0x22b   : > { %v977_v62 = vpop.f32.mrf.mxu0  ;;  %v1468_v63 = vpop.f32.mrf.mxu1 }
 0x22c   : > { %1759 = vst [vmem:[%s2848_s12 + $0x90] sm:$0xff] %v1467_v22  ;;  %v978_v23 = vadd.f32 %v977_v62, %v2700_v28  ;;  %v1469_v1 = vadd.f32 %v1468_v63, %v2843_v60  ;;  %1710 = vmatprep.mubr.bf16.mxu1 %v1179_v59  ;;  %v1113_v7 = vmax.f32 %v976_v11, 0.0 }
 0x22d   : > { %v979_v18 = vpop.f32.mrf.mxu0  ;;  %v1472_v3 = vpop.f32.mrf.mxu1  ;;  %1711 = vmatmul.mubr.bf16.gmra.mxu1 %v1178_v61 }
 0x22e   : > { %1760 = vst [vmem:[%s2848_s12 + $0x98] sm:$0xff] %v1469_v1  ;;  %v980_v4 = vadd.f32 %v979_v18, %v2704_v29  ;;  %v1473_v19 = vadd.f32 %v1472_v3, %v2837_v56  ;;  %v1114_v24 = vmax.f32 %v978_v23, 0.0 }
 0x22f   : > { %v983_v5 = vpop.f32.mrf.mxu0  ;;  %v1474_v6 = vpop.f32.mrf.mxu1 }
 0x230   : > { %v1115_v8 = vmax.f32 %v980_v4, 0.0  ;;  %1761 = vst [vmem:[%s2848_s12 + $0xa0] sm:$0xff] %v1473_v19  ;;  %v1475_v9 = vadd.f32 %v1474_v6, %v2843_v60  ;;  %v1180_v20 = vpack.c.bf16 %v1114_v24, %v1112_v10  ;;  %v984_v33 = vadd.f32 %v983_v5, %v2700_v28 }
 0x231   : > { %v985_v14 = vpop.f32.mrf.mxu0  ;;  %v1476_v16 = vpop.f32.mrf.mxu1 }
 0x232   : > { %v1181_v21 = vpack.c.bf16 %v1115_v8, %v1113_v7  ;;  %1762 = vst [vmem:[%s2848_s12 + $0xa8] sm:$0xff] %v1475_v9  ;;  %v1477_v25 = vadd.f32 %v1476_v16, %v2837_v56  ;;  %v986_v30 = vadd.f32 %v985_v14, %v2704_v29  ;;  %v1116_v43 = vmax.f32 %v984_v33, 0.0 }
 0x233   : > { %v987_v26 = vpop.f32.mrf.mxu0  ;;  %v1478_v27 = vpop.f32.mrf.mxu1 }
 0x234   : > { %1763 = vst [vmem:[%s2848_s12 + $0xb0] sm:$0xff] %v1477_v25  ;;  %v988_v31 = vadd.f32 %v987_v26, %v2700_v28  ;;  %v1479_v32 = vadd.f32 %v1478_v27, %v2843_v60  ;;  %1720 = vmatprep.mubr.bf16.mxu1 %v1181_v21  ;;  %v1117_v40 = vmax.f32 %v986_v30, 0.0 }
 0x235   : > { %v989_v17 = vpop.f32.mrf.mxu0  ;;  %v1482_v34 = vpop.f32.mrf.mxu1  ;;  %1721 = vmatmul.mubr.bf16.gmra.mxu1 %v1180_v20 }
 0x236   : > { %1764 = vst [vmem:[%s2848_s12 + $0xb8] sm:$0xff] %v1479_v32  ;;  %v990_v35 = vadd.f32 %v989_v17, %v2704_v29  ;;  %v1483_v36 = vadd.f32 %v1482_v34, %v2837_v56  ;;  %v1118_v37 = vmax.f32 %v988_v31, 0.0 }
 0x237   : > { %v1422_v38 = vpop.f32.mrf.mxu0  ;;  %v1484_v39 = vpop.f32.mrf.mxu1 }
 0x238   : > { %v1119_v41 = vmax.f32 %v990_v35, 0.0  ;;  %1765 = vst [vmem:[%s2848_s12 + $0xc0] sm:$0xff] %v1483_v36  ;;  %v1423_v28 = vadd.f32 %v1422_v38, %v2837_v56  ;;  %v1485_v42 = vadd.f32 %v1484_v39, %v2843_v60  ;;  %v1182_v12 = vpack.c.bf16 %v1118_v37, %v1116_v43 }
 0x239   : > { %v1424_v44 = vpop.f32.mrf.mxu0  ;;  %v1486_v15 = vpop.f32.mrf.mxu1 }
 0x23a   : > { %v1183_v45 = vpack.c.bf16 %v1119_v41, %v1117_v40  ;;  %1741 = vst [vmem:[%s2848_s12] sm:$0xff] %v1423_v28  ;;  %1766 = vst [vmem:[%s2848_s12 + $0xc8] sm:$0xff] %v1485_v42  ;;  %v1425_v29 = vadd.f32 %v1424_v44, %v2843_v60  ;;  %v1487_v46 = vadd.f32 %v1486_v15, %v2837_v56 }
 0x23b   : > { %v1426_v47 = vpop.f32.mrf.mxu0  ;;  %v1488_v48 = vpop.f32.mrf.mxu1 }
 0x23c   : > { %1742 = vst [vmem:[%s2848_s12 + $0x8] sm:$0xff] %v1425_v29  ;;  %1767 = vst [vmem:[%s2848_s12 + $0xd0] sm:$0xff] %v1487_v46  ;;  %v1427_v0 = vadd.f32 %v1426_v47, %v2837_v56  ;;  %v1489_v49 = vadd.f32 %v1488_v48, %v2843_v60  ;;  %1730 = vmatprep.mubr.bf16.mxu1 %v1183_v45 }
 0x23d   : > { %v1428_v50 = vpop.f32.mrf.mxu0  ;;  %v1492_v51 = vpop.f32.mrf.mxu1  ;;  %1731 = vmatmul.mubr.bf16.gmra.mxu1 %v1182_v12 }
 0x23e   : > { %1743 = vst [vmem:[%s2848_s12 + $0x10] sm:$0xff] %v1427_v0  ;;  %1768 = vst [vmem:[%s2848_s12 + $0xd8] sm:$0xff] %v1489_v49  ;;  %v1429_v52 = vadd.f32 %v1428_v50, %v2843_v60  ;;  %v1493_v53 = vadd.f32 %v1492_v51, %v2837_v56 }
 0x23f   : > { %v1432_v54 = vpop.f32.mrf.mxu0  ;;  %v1494_v13 = vpop.f32.mrf.mxu1 }
 0x240   : > { %1744 = vst [vmem:[%s2848_s12 + $0x18] sm:$0xff] %v1429_v52  ;;  %1769 = vst [vmem:[%s2848_s12 + $0xe0] sm:$0xff] %v1493_v53  ;;  %v1433_v55 = vadd.f32 %v1432_v54, %v2837_v56  ;;  %v1495_v57 = vadd.f32 %v1494_v13, %v2843_v60 }
 0x241   : > { %v1434_v58 = vpop.f32.mrf.mxu0  ;;  %v1496_v59 = vpop.f32.mrf.mxu1 }
 0x242   : > { %1745 = vst [vmem:[%s2848_s12 + $0x20] sm:$0xff] %v1433_v55  ;;  %1770 = vst [vmem:[%s2848_s12 + $0xe8] sm:$0xff] %v1495_v57  ;;  %v1435_v22 = vadd.f32 %v1434_v58, %v2843_v60  ;;  %v1497_v61 = vadd.f32 %v1496_v59, %v2837_v56 }
 0x243   : > { %v1436_v62 = vpop.f32.mrf.mxu0  ;;  %v1498_v63 = vpop.f32.mrf.mxu1 }
 0x244   : > { %1746 = vst [vmem:[%s2848_s12 + $0x28] sm:$0xff] %v1435_v22  ;;  %1771 = vst [vmem:[%s2848_s12 + $0xf0] sm:$0xff] %v1497_v61  ;;  %v1437_v11 = vadd.f32 %v1436_v62, %v2837_v56  ;;  %v1499_v23 = vadd.f32 %v1498_v63, %v2843_v60 }
 0x245   : > { %v1438_v1 = vpop.f32.mrf.mxu0  ;;  %v1502_v2 = vpop.f32.mrf.mxu1 }
 0x246   : > { %1747 = vst [vmem:[%s2848_s12 + $0x30] sm:$0xff] %v1437_v11  ;;  %1772 = vst [vmem:[%s2848_s12 + $0xf8] sm:$0xff] %v1499_v23  ;;  %v1439_v18 = vadd.f32 %v1438_v1, %v2843_v60  ;;  %v1503_v3 = vadd.f32 %v1502_v2, %v2837_v56 }
 0x247   : > { %v1504_v4 = vpop.f32.mrf.mxu1 }
 0x248   : > { %1748 = vst [vmem:[%s2848_s12 + $0x38] sm:$0xff] %v1439_v18  ;;  %1773 = vst [vmem:[%s2848_s12 + $0x100] sm:$0xff] %v1503_v3  ;;  %v1505_v19 = vadd.f32 %v1504_v4, %v2843_v60 }
 0x249   : > { %v1506_v24 = vpop.f32.mrf.mxu1 }
 0x24a   : > { %1774 = vst [vmem:[%s2848_s12 + $0x108] sm:$0xff] %v1505_v19  ;;  %v1507_v5 = vadd.f32 %v1506_v24, %v2837_v56 }
 0x24b   : > { %v1508_v6 = vpop.f32.mrf.mxu1 }
 0x24c   : > { %1775 = vst [vmem:[%s2848_s12 + $0x110] sm:$0xff] %v1507_v5  ;;  %v1509_v7 = vadd.f32 %v1508_v6, %v2843_v60 }
 0x24d   : > { %v1512_v8 = vpop.f32.mrf.mxu1 }
 0x24e   : > { %1776 = vst [vmem:[%s2848_s12 + $0x118] sm:$0xff] %v1509_v7  ;;  %v1513_v9 = vadd.f32 %v1512_v8, %v2837_v56 }
 0x24f   : > { %v1514_v10 = vpop.f32.mrf.mxu1 }
 0x250   : > { %1777 = vst [vmem:[%s2848_s12 + $0x120] sm:$0xff] %v1513_v9  ;;  %v1515_v14 = vadd.f32 %v1514_v10, %v2843_v60 }
 0x251   : > { %v1516_v16 = vpop.f32.mrf.mxu1 }
 0x252   : > { %1778 = vst [vmem:[%s2848_s12 + $0x128] sm:$0xff] %v1515_v14  ;;  %v1517_v21 = vadd.f32 %v1516_v16, %v2837_v56 }
 0x253   : > { %v1518_v25 = vpop.f32.mrf.mxu1 }
 0x254   : > { %1779 = vst [vmem:[%s2848_s12 + $0x130] sm:$0xff] %v1517_v21  ;;  %v1519_v20 = vadd.f32 %v1518_v25, %v2843_v60 }
 0x255   : > { %v1522_v26 = vpop.f32.mrf.mxu1 }
 0x256   : > { %1780 = vst [vmem:[%s2848_s12 + $0x138] sm:$0xff] %v1519_v20  ;;  %v1523_v27 = vadd.f32 %v1522_v26, %v2837_v56 }
 0x257   : > { %v1524_v30 = vpop.f32.mrf.mxu1 }
 0x258   : > { %1781 = vst [vmem:[%s2848_s12 + $0x140] sm:$0xff] %v1523_v27  ;;  %v1525_v31 = vadd.f32 %v1524_v30, %v2843_v60 }
 0x259   : > { %v1526_v32 = vpop.f32.mrf.mxu1 }
 0x25a   : > { %1782 = vst [vmem:[%s2848_s12 + $0x148] sm:$0xff] %v1525_v31  ;;  %v1527_v33 = vadd.f32 %v1526_v32, %v2837_v56 }
 0x25b   : > { %v1528_v17 = vpop.f32.mrf.mxu1 }
 0x25c   : > { %1783 = vst [vmem:[%s2848_s12 + $0x150] sm:$0xff] %v1527_v33  ;;  %v1529_v34 = vadd.f32 %v1528_v17, %v2843_v60 }
 0x25d   : > { %v1532_v35 = vpop.f32.mrf.mxu1 }
 0x25e   : > { %1784 = vst [vmem:[%s2848_s12 + $0x158] sm:$0xff] %v1529_v34  ;;  %v1533_v36 = vadd.f32 %v1532_v35, %v2837_v56 }
 0x25f   : > { %v1534_v37 = vpop.f32.mrf.mxu1 }
 0x260   : > { %1785 = vst [vmem:[%s2848_s12 + $0x160] sm:$0xff] %v1533_v36  ;;  %v1535_v38 = vadd.f32 %v1534_v37, %v2843_v60 }
 0x261   : > { %v1536_v39 = vpop.f32.mrf.mxu1 }
 0x262   : > { %1786 = vst [vmem:[%s2848_s12 + $0x168] sm:$0xff] %v1535_v38  ;;  %v1537_v40 = vadd.f32 %v1536_v39, %v2837_v56 }
 0x263   : > { %v1538_v41 = vpop.f32.mrf.mxu1 }
 0x264   : > { %1787 = vst [vmem:[%s2848_s12 + $0x170] sm:$0xff] %v1537_v40  ;;  %v1539_v28 = vadd.f32 %v1538_v41, %v2843_v60 }
 0x265   : > { %v1542_v42 = vpop.f32.mrf.mxu1 }
 0x266   : > { %1788 = vst [vmem:[%s2848_s12 + $0x178] sm:$0xff] %v1539_v28  ;;  %v1543_v43 = vadd.f32 %v1542_v42, %v2837_v56 }
 0x267   : > { %v1544_v44 = vpop.f32.mrf.mxu1 }
 0x268   : > { %1789 = vst [vmem:[%s2848_s12 + $0x180] sm:$0xff] %v1543_v43  ;;  %v1545_v15 = vadd.f32 %v1544_v44, %v2843_v60 }
 0x269   : > { %v1546_v45 = vpop.f32.mrf.mxu1 }
 0x26a   : > { %1790 = vst [vmem:[%s2848_s12 + $0x188] sm:$0xff] %v1545_v15  ;;  %v1547_v29 = vadd.f32 %v1546_v45, %v2837_v56 }
 0x26b   : > { %v1548_v46 = vpop.f32.mrf.mxu1 }
 0x26c   : > { %1791 = vst [vmem:[%s2848_s12 + $0x190] sm:$0xff] %v1547_v29  ;;  %v1549_v12 = vadd.f32 %v1548_v46, %v2843_v60 }
 0x26d   : > { %v1552_v47 = vpop.f32.mrf.mxu1 }
 0x26e   : > { %1792 = vst [vmem:[%s2848_s12 + $0x198] sm:$0xff] %v1549_v12  ;;  %v1553_v48 = vadd.f32 %v1552_v47, %v2837_v56 }
 0x26f   : > { %v1554_v0 = vpop.f32.mrf.mxu1 }
 0x270   : > { %1793 = vst [vmem:[%s2848_s12 + $0x1a0] sm:$0xff] %v1553_v48  ;;  %v1555_v49 = vadd.f32 %v1554_v0, %v2843_v60 }
 0x271   : > { %v1556_v50 = vpop.f32.mrf.mxu1 }
 0x272   : > { %1794 = vst [vmem:[%s2848_s12 + $0x1a8] sm:$0xff] %v1555_v49  ;;  %v1557_v51 = vadd.f32 %v1556_v50, %v2837_v56 }
 0x273   : > { %v1558_v52 = vpop.f32.mrf.mxu1 }
 0x274   : > { %1795 = vst [vmem:[%s2848_s12 + $0x1b0] sm:$0xff] %v1557_v51  ;;  %v1559_v53 = vadd.f32 %v1558_v52, %v2843_v60 }
 0x275   : > { %v1562_v54 = vpop.f32.mrf.mxu1 }
 0x276   : > { %1796 = vst [vmem:[%s2848_s12 + $0x1b8] sm:$0xff] %v1559_v53  ;;  %v1563_v13 = vadd.f32 %v1562_v54, %v2837_v56 }
 0x277   : > { %v1564_v55 = vpop.f32.mrf.mxu1 }
 0x278   : > { %1797 = vst [vmem:[%s2848_s12 + $0x1c0] sm:$0xff] %v1563_v13  ;;  %v1565_v57 = vadd.f32 %v1564_v55, %v2843_v60 }
 0x279   : > { %v1566_v58 = vpop.f32.mrf.mxu1 }
 0x27a   : > { %1798 = vst [vmem:[%s2848_s12 + $0x1c8] sm:$0xff] %v1565_v57  ;;  %v1567_v59 = vadd.f32 %v1566_v58, %v2837_v56 }
 0x27b   : > { %v1568_v22 = vpop.f32.mrf.mxu1 }
 0x27c   : > { %1799 = vst [vmem:[%s2848_s12 + $0x1d0] sm:$0xff] %v1567_v59  ;;  %v1569_v61 = vadd.f32 %v1568_v22, %v2843_v60 }
 0x27d   : > { %v1572_v62 = vpop.f32.mrf.mxu1 }
 0x27e   : > { %1800 = vst [vmem:[%s2848_s12 + $0x1d8] sm:$0xff] %v1569_v61  ;;  %v1573_v63 = vadd.f32 %v1572_v62, %v2837_v56 }
 0x27f   : > { %v1574_v11 = vpop.f32.mrf.mxu1 }
 0x280   : > { %1801 = vst [vmem:[%s2848_s12 + $0x1e0] sm:$0xff] %v1573_v63  ;;  %v1575_v23 = vadd.f32 %v1574_v11, %v2843_v60 }
 0x281   : > { %v1576_v1 = vpop.f32.mrf.mxu1 }
 0x282   : > { %1802 = vst [vmem:[%s2848_s12 + $0x1e8] sm:$0xff] %v1575_v23  ;;  %v1577_v2 = vadd.f32 %v1576_v1, %v2837_v56 }
 0x283   : > { %v1578_v18 = vpop.f32.mrf.mxu1 }
 0x284   : > { %1803 = vst [vmem:[%s2848_s12 + $0x1f0] sm:$0xff] %v1577_v2  ;;  %v1579_v3 = vadd.f32 %v1578_v18, %v2843_v60 }
 0x285   : > { %v1582_v4 = vpop.f32.mrf.mxu1 }
 0x286   : > { %1804 = vst [vmem:[%s2848_s12 + $0x1f8] sm:$0xff] %v1579_v3  ;;  %v1583_v19 = vadd.f32 %v1582_v4, %v2837_v56 }
 0x287   : > { %v1584_v24 = vpop.f32.mrf.mxu1 }
 0x288   : > { %1805 = vst [vmem:[%s2848_s12 + $0x200] sm:$0xff] %v1583_v19  ;;  %v1585_v5 = vadd.f32 %v1584_v24, %v2843_v60 }
 0x289   : > { %v1586_v6 = vpop.f32.mrf.mxu1 }
 0x28a   : > { %1806 = vst [vmem:[%s2848_s12 + $0x208] sm:$0xff] %v1585_v5  ;;  %v1587_v7 = vadd.f32 %v1586_v6, %v2837_v56 }
 0x28b   : > { %v1588_v8 = vpop.f32.mrf.mxu1 }
 0x28c   : > { %1807 = vst [vmem:[%s2848_s12 + $0x210] sm:$0xff] %v1587_v7  ;;  %v1589_v9 = vadd.f32 %v1588_v8, %v2843_v60 }
 0x28d   : > { %v1592_v10 = vpop.f32.mrf.mxu1 }
 0x28e   : > { %1808 = vst [vmem:[%s2848_s12 + $0x218] sm:$0xff] %v1589_v9  ;;  %v1593_v14 = vadd.f32 %v1592_v10, %v2837_v56 }
 0x28f   : > { %v1594_v16 = vpop.f32.mrf.mxu1 }
 0x290   : > { %1809 = vst [vmem:[%s2848_s12 + $0x220] sm:$0xff] %v1593_v14  ;;  %v1595_v21 = vadd.f32 %v1594_v16, %v2843_v60 }
 0x291   : > { %v1596_v25 = vpop.f32.mrf.mxu1 }
 0x292   : > { %1810 = vst [vmem:[%s2848_s12 + $0x228] sm:$0xff] %v1595_v21  ;;  %v1597_v20 = vadd.f32 %v1596_v25, %v2837_v56 }
 0x293   : > { %v1598_v26 = vpop.f32.mrf.mxu1 }
 0x294   : > { %1811 = vst [vmem:[%s2848_s12 + $0x230] sm:$0xff] %v1597_v20  ;;  %v1599_v27 = vadd.f32 %v1598_v26, %v2843_v60 }
 0x295   : > { %v1602_v30 = vpop.f32.mrf.mxu1 }
 0x296   : > { %1812 = vst [vmem:[%s2848_s12 + $0x238] sm:$0xff] %v1599_v27  ;;  %v1603_v31 = vadd.f32 %v1602_v30, %v2837_v56 }
 0x297   : > { %v1604_v32 = vpop.f32.mrf.mxu1 }
 0x298   : > { %1813 = vst [vmem:[%s2848_s12 + $0x240] sm:$0xff] %v1603_v31  ;;  %v1605_v33 = vadd.f32 %v1604_v32, %v2843_v60 }
 0x299   : > { %v1606_v17 = vpop.f32.mrf.mxu1 }
 0x29a   : > { %1814 = vst [vmem:[%s2848_s12 + $0x248] sm:$0xff] %v1605_v33  ;;  %v1607_v34 = vadd.f32 %v1606_v17, %v2837_v56 }
 0x29b   : > { %v1608_v35 = vpop.f32.mrf.mxu1 }
 0x29c   : > { %1815 = vst [vmem:[%s2848_s12 + $0x250] sm:$0xff] %v1607_v34  ;;  %v1609_v36 = vadd.f32 %v1608_v35, %v2843_v60 }
 0x29d   : > { %v1612_v37 = vpop.f32.mrf.mxu1 }
 0x29e   : > { %1816 = vst [vmem:[%s2848_s12 + $0x258] sm:$0xff] %v1609_v36  ;;  %v1613_v38 = vadd.f32 %v1612_v37, %v2837_v56 }
 0x29f   : > { %v1614_v39 = vpop.f32.mrf.mxu1 }
 0x2a0   : > { %1817 = vst [vmem:[%s2848_s12 + $0x260] sm:$0xff] %v1613_v38  ;;  %v1615_v40 = vadd.f32 %v1614_v39, %v2843_v60 }
 0x2a1   : > { %v1616_v41 = vpop.f32.mrf.mxu1 }
 0x2a2   : > { %1818 = vst [vmem:[%s2848_s12 + $0x268] sm:$0xff] %v1615_v40  ;;  %v1617_v28 = vadd.f32 %v1616_v41, %v2837_v56 }
 0x2a3   : > { %v1618_v42 = vpop.f32.mrf.mxu1 }
 0x2a4   : > { %1819 = vst [vmem:[%s2848_s12 + $0x270] sm:$0xff] %v1617_v28  ;;  %v1619_v43 = vadd.f32 %v1618_v42, %v2843_v60 }
 0x2a5   : > { %v1622_v44 = vpop.f32.mrf.mxu1 }
 0x2a6   : > { %1820 = vst [vmem:[%s2848_s12 + $0x278] sm:$0xff] %v1619_v43  ;;  %v1623_v15 = vadd.f32 %v1622_v44, %v2837_v56 }
 0x2a7   : > { %v1624_v45 = vpop.f32.mrf.mxu1 }
 0x2a8   : > { %1821 = vst [vmem:[%s2848_s12 + $0x280] sm:$0xff] %v1623_v15  ;;  %v1625_v29 = vadd.f32 %v1624_v45, %v2843_v60 }
 0x2a9   : > { %v1626_v46 = vpop.f32.mrf.mxu1 }
 0x2aa   : > { %1822 = vst [vmem:[%s2848_s12 + $0x288] sm:$0xff] %v1625_v29  ;;  %v1627_v12 = vadd.f32 %v1626_v46, %v2837_v56 }
 0x2ab   : > { %v1628_v47 = vpop.f32.mrf.mxu1 }
 0x2ac   : > { %1823 = vst [vmem:[%s2848_s12 + $0x290] sm:$0xff] %v1627_v12  ;;  %v1629_v48 = vadd.f32 %v1628_v47, %v2843_v60 }
 0x2ad   : > { %v1632_v0 = vpop.f32.mrf.mxu1 }
 0x2ae   : > { %1824 = vst [vmem:[%s2848_s12 + $0x298] sm:$0xff] %v1629_v48  ;;  %v1633_v49 = vadd.f32 %v1632_v0, %v2837_v56 }
 0x2af   : > { %v1634_v50 = vpop.f32.mrf.mxu1 }
 0x2b0   : > { %1825 = vst [vmem:[%s2848_s12 + $0x2a0] sm:$0xff] %v1633_v49  ;;  %v1635_v51 = vadd.f32 %v1634_v50, %v2843_v60 }
 0x2b1   : > { %v1636_v52 = vpop.f32.mrf.mxu1 }
 0x2b2   : > { %1826 = vst [vmem:[%s2848_s12 + $0x2a8] sm:$0xff] %v1635_v51  ;;  %v1637_v53 = vadd.f32 %v1636_v52, %v2837_v56 }
 0x2b3   : > { %v1638_v54 = vpop.f32.mrf.mxu1 }
 0x2b4   : > { %1827 = vst [vmem:[%s2848_s12 + $0x2b0] sm:$0xff] %v1637_v53  ;;  %v1639_v13 = vadd.f32 %v1638_v54, %v2843_v60 }
 0x2b5   : > { %v1642_v55 = vpop.f32.mrf.mxu1 }
 0x2b6   : > { %1828 = vst [vmem:[%s2848_s12 + $0x2b8] sm:$0xff] %v1639_v13  ;;  %v1643_v57 = vadd.f32 %v1642_v55, %v2837_v56 }
 0x2b7   : > { %v1644_v58 = vpop.f32.mrf.mxu1 }
 0x2b8   : > { %1829 = vst [vmem:[%s2848_s12 + $0x2c0] sm:$0xff] %v1643_v57  ;;  %v1645_v59 = vadd.f32 %v1644_v58, %v2843_v60 }
 0x2b9   : > { %v1646_v22 = vpop.f32.mrf.mxu1 }
 0x2ba   : > { %1830 = vst [vmem:[%s2848_s12 + $0x2c8] sm:$0xff] %v1645_v59  ;;  %v1647_v61 = vadd.f32 %v1646_v22, %v2837_v56 }
 0x2bb   : > { %v1648_v62 = vpop.f32.mrf.mxu1 }
 0x2bc   : > { %1831 = vst [vmem:[%s2848_s12 + $0x2d0] sm:$0xff] %v1647_v61  ;;  %v1649_v63 = vadd.f32 %v1648_v62, %v2843_v60 }
 0x2bd   : > { %v1652_v11 = vpop.f32.mrf.mxu1 }
 0x2be   : > { %1832 = vst [vmem:[%s2848_s12 + $0x2d8] sm:$0xff] %v1649_v63  ;;  %v1653_v23 = vadd.f32 %v1652_v11, %v2837_v56 }
 0x2bf   : > { %v1654_v1 = vpop.f32.mrf.mxu1 }
 0x2c0   : > { %1833 = vst [vmem:[%s2848_s12 + $0x2e0] sm:$0xff] %v1653_v23  ;;  %v1655_v2 = vadd.f32 %v1654_v1, %v2843_v60 }
 0x2c1   : > { %v1656_v18 = vpop.f32.mrf.mxu1 }
 0x2c2   : > { %1834 = vst [vmem:[%s2848_s12 + $0x2e8] sm:$0xff] %v1655_v2  ;;  %v1657_v3 = vadd.f32 %v1656_v18, %v2837_v56 }
 0x2c3   : > { %v1658_v4 = vpop.f32.mrf.mxu1 }
 0x2c4   : > { %1835 = vst [vmem:[%s2848_s12 + $0x2f0] sm:$0xff] %v1657_v3  ;;  %v1659_v19 = vadd.f32 %v1658_v4, %v2843_v60 }
 0x2c5   : > { %v1662_v24 = vpop.f32.mrf.mxu1 }
 0x2c6   : > { %1836 = vst [vmem:[%s2848_s12 + $0x2f8] sm:$0xff] %v1659_v19  ;;  %v1663_v5 = vadd.f32 %v1662_v24, %v2837_v56 }
 0x2c7   : > { %v1664_v6 = vpop.f32.mrf.mxu1 }
 0x2c8   : > { %1837 = vst [vmem:[%s2848_s12 + $0x300] sm:$0xff] %v1663_v5  ;;  %v1665_v7 = vadd.f32 %v1664_v6, %v2843_v60 }
 0x2c9   : > { %v1666_v8 = vpop.f32.mrf.mxu1 }
 0x2ca   : > { %1838 = vst [vmem:[%s2848_s12 + $0x308] sm:$0xff] %v1665_v7  ;;  %v1667_v9 = vadd.f32 %v1666_v8, %v2837_v56 }
 0x2cb   : > { %v1668_v10 = vpop.f32.mrf.mxu1 }
 0x2cc   : > { %1839 = vst [vmem:[%s2848_s12 + $0x310] sm:$0xff] %v1667_v9  ;;  %v1669_v14 = vadd.f32 %v1668_v10, %v2843_v60 }
 0x2cd   : > { %v1672_v16 = vpop.f32.mrf.mxu1 }
 0x2ce   : > { %1840 = vst [vmem:[%s2848_s12 + $0x318] sm:$0xff] %v1669_v14  ;;  %v1673_v21 = vadd.f32 %v1672_v16, %v2837_v56 }
 0x2cf   : > { %v1674_v25 = vpop.f32.mrf.mxu1 }
 0x2d0   : > { %1841 = vst [vmem:[%s2848_s12 + $0x320] sm:$0xff] %v1673_v21  ;;  %v1675_v20 = vadd.f32 %v1674_v25, %v2843_v60 }
 0x2d1   : > { %v1676_v26 = vpop.f32.mrf.mxu1 }
 0x2d2   : > { %1842 = vst [vmem:[%s2848_s12 + $0x328] sm:$0xff] %v1675_v20  ;;  %v1677_v27 = vadd.f32 %v1676_v26, %v2837_v56 }
 0x2d3   : > { %v1678_v30 = vpop.f32.mrf.mxu1 }
 0x2d4   : > { %1843 = vst [vmem:[%s2848_s12 + $0x330] sm:$0xff] %v1677_v27  ;;  %v1679_v31 = vadd.f32 %v1678_v30, %v2843_v60 }
 0x2d5   : > { %v1682_v32 = vpop.f32.mrf.mxu1 }
 0x2d6   : > { %1844 = vst [vmem:[%s2848_s12 + $0x338] sm:$0xff] %v1679_v31  ;;  %v1683_v33 = vadd.f32 %v1682_v32, %v2837_v56 }
 0x2d7   : > { %v1684_v17 = vpop.f32.mrf.mxu1 }
 0x2d8   : > { %1845 = vst [vmem:[%s2848_s12 + $0x340] sm:$0xff] %v1683_v33  ;;  %v1685_v34 = vadd.f32 %v1684_v17, %v2843_v60 }
 0x2d9   : > { %v1686_v35 = vpop.f32.mrf.mxu1 }
 0x2da   : > { %1846 = vst [vmem:[%s2848_s12 + $0x348] sm:$0xff] %v1685_v34  ;;  %v1687_v36 = vadd.f32 %v1686_v35, %v2837_v56 }
 0x2db   : > { %v1688_v37 = vpop.f32.mrf.mxu1 }
 0x2dc   : > { %1847 = vst [vmem:[%s2848_s12 + $0x350] sm:$0xff] %v1687_v36  ;;  %v1689_v38 = vadd.f32 %v1688_v37, %v2843_v60 }
 0x2dd   : > { %v1692_v39 = vpop.f32.mrf.mxu1 }
 0x2de   : > { %1848 = vst [vmem:[%s2848_s12 + $0x358] sm:$0xff] %v1689_v38  ;;  %v1693_v40 = vadd.f32 %v1692_v39, %v2837_v56 }
 0x2df   : > { %v1694_v41 = vpop.f32.mrf.mxu1 }
 0x2e0   : > { %1849 = vst [vmem:[%s2848_s12 + $0x360] sm:$0xff] %v1693_v40  ;;  %v1695_v28 = vadd.f32 %v1694_v41, %v2843_v60 }
 0x2e1   : > { %v1696_v42 = vpop.f32.mrf.mxu1 }
 0x2e2   : > { %1850 = vst [vmem:[%s2848_s12 + $0x368] sm:$0xff] %v1695_v28  ;;  %v1697_v43 = vadd.f32 %v1696_v42, %v2837_v56 }
 0x2e3   : > { %v1698_v44 = vpop.f32.mrf.mxu1 }
 0x2e4   : > { %1851 = vst [vmem:[%s2848_s12 + $0x370] sm:$0xff] %v1697_v43  ;;  %v1699_v15 = vadd.f32 %v1698_v44, %v2843_v60 }
 0x2e5   : > { %v1702_v45 = vpop.f32.mrf.mxu1 }
 0x2e6   : > { %1852 = vst [vmem:[%s2848_s12 + $0x378] sm:$0xff] %v1699_v15  ;;  %v1703_v29 = vadd.f32 %v1702_v45, %v2837_v56 }
 0x2e7   : > { %v1704_v46 = vpop.f32.mrf.mxu1 }
 0x2e8   : > { %1853 = vst [vmem:[%s2848_s12 + $0x380] sm:$0xff] %v1703_v29  ;;  %v1705_v12 = vadd.f32 %v1704_v46, %v2843_v60 }
 0x2e9   : > { %v1706_v47 = vpop.f32.mrf.mxu1 }
 0x2ea   : > { %1854 = vst [vmem:[%s2848_s12 + $0x388] sm:$0xff] %v1705_v12  ;;  %v1707_v48 = vadd.f32 %v1706_v47, %v2837_v56 }
 0x2eb   : > { %v1708_v0 = vpop.f32.mrf.mxu1 }
 0x2ec   : > { %1855 = vst [vmem:[%s2848_s12 + $0x390] sm:$0xff] %v1707_v48  ;;  %v1709_v49 = vadd.f32 %v1708_v0, %v2843_v60 }
 0x2ed   : > { %v1712_v50 = vpop.f32.mrf.mxu1 }
 0x2ee   : > { %1856 = vst [vmem:[%s2848_s12 + $0x398] sm:$0xff] %v1709_v49  ;;  %v1713_v51 = vadd.f32 %v1712_v50, %v2837_v56 }
 0x2ef   : > { %v1714_v52 = vpop.f32.mrf.mxu1 }
 0x2f0   : > { %1857 = vst [vmem:[%s2848_s12 + $0x3a0] sm:$0xff] %v1713_v51  ;;  %v1715_v53 = vadd.f32 %v1714_v52, %v2843_v60 }
 0x2f1   : > { %v1716_v54 = vpop.f32.mrf.mxu1 }
 0x2f2   : > { %1858 = vst [vmem:[%s2848_s12 + $0x3a8] sm:$0xff] %v1715_v53  ;;  %v1717_v13 = vadd.f32 %v1716_v54, %v2837_v56 }
 0x2f3   : > { %v1718_v55 = vpop.f32.mrf.mxu1 }
 0x2f4   : > { %1859 = vst [vmem:[%s2848_s12 + $0x3b0] sm:$0xff] %v1717_v13  ;;  %v1719_v57 = vadd.f32 %v1718_v55, %v2843_v60 }
 0x2f5   : > { %v1722_v58 = vpop.f32.mrf.mxu1 }
 0x2f6   : > { %1860 = vst [vmem:[%s2848_s12 + $0x3b8] sm:$0xff] %v1719_v57  ;;  %v1723_v59 = vadd.f32 %v1722_v58, %v2837_v56 }
 0x2f7   : > { %v1724_v22 = vpop.f32.mrf.mxu1 }
 0x2f8   : > { %1861 = vst [vmem:[%s2848_s12 + $0x3c0] sm:$0xff] %v1723_v59  ;;  %v1725_v61 = vadd.f32 %v1724_v22, %v2843_v60 }
 0x2f9   : > { %v1726_v62 = vpop.f32.mrf.mxu1 }
 0x2fa   : > { %1862 = vst [vmem:[%s2848_s12 + $0x3c8] sm:$0xff] %v1725_v61  ;;  %v1727_v63 = vadd.f32 %v1726_v62, %v2837_v56 }
 0x2fb   : > { %v1728_v11 = vpop.f32.mrf.mxu1 }
 0x2fc   : > { %1863 = vst [vmem:[%s2848_s12 + $0x3d0] sm:$0xff] %v1727_v63  ;;  %v1729_v23 = vadd.f32 %v1728_v11, %v2843_v60 }
 0x2fd   : > { %v1732_v1 = vpop.f32.mrf.mxu1 }
 0x2fe   : > { %1864 = vst [vmem:[%s2848_s12 + $0x3d8] sm:$0xff] %v1729_v23  ;;  %v1733_v2 = vadd.f32 %v1732_v1, %v2837_v56 }
 0x2ff   : > { %v1734_v18 = vpop.f32.mrf.mxu1 }
 0x300   : > { %1865 = vst [vmem:[%s2848_s12 + $0x3e0] sm:$0xff] %v1733_v2  ;;  %v1735_v3 = vadd.f32 %v1734_v18, %v2843_v60 }
 0x301   : > { %v1736_v4 = vpop.f32.mrf.mxu1 }
 0x302   : > { %1866 = vst [vmem:[%s2848_s12 + $0x3e8] sm:$0xff] %v1735_v3  ;;  %v1737_v19 = vadd.f32 %v1736_v4, %v2837_v56 }
 0x303   : > { %v1738_v24 = vpop.f32.mrf.mxu1 }
 0x304   : > { %1867 = vst [vmem:[%s2848_s12 + $0x3f0] sm:$0xff] %v1737_v19  ;;  %v1739_v5 = vadd.f32 %v1738_v24, %v2843_v60 }
 0x306   : > { %1868 = vst [vmem:[%s2848_s12 + $0x3f8] sm:$0xff] %v1739_v5 }
 0x307   : > { %2381 = shalt.err (!%p2378_p9)
}
 0x308   : > { %s2382_s24 = scalar_lea.hbm %s3123_s13, 16384  ;;  %s2386_s10 = scalar_lea.hbm %s3176_s5, 32768 }
 0x309   : > { %p2383_p13 = scmp.ne.s32.totalorder %s3123_s13, %s2382_s24  ;;  %p2387_p4 = scmp.lt.s32.totalorder %s3123_s13, %s3176_s5 }
 0x30a   : > { %p2388_p8 = scmp.lt.s32.totalorder %s2386_s10, %s2382_s24 }
 0x30b   : > { %p2384_p5 = pnand %p2383_p13, %p3192_p10 }
 0x30c   : > { %p2389_p3 = por %p2388_p8, %p2387_p4 }
 0x30d   : > { %p2385_p0 = pneg %p2384_p5 }
 0x30f   : > { %p2390_p11 = pnand %p2389_p3, %p2385_p0 }
 0x311   : > { %2393 = shalt.err (!%p2390_p11)
}
 0x312   : > { %s2447_s28 = smov 256   ;;  %s2448_s7 = smov 16  }
 0x313   : > { %2120 = dma.vmem_to_hbm [thread:$0]  (%p3192_p10), %s3125_s6, 16384, %s3123_s13, %s1870_s22, %s2447_s28, %s2447_s28, %s2448_s7  }
 0x314 PF: > { %s1899_s9 = sand.u32 1, %s2424_s18   ;;  %p3193_p1 = scmp.ne.s32.totalorder %s3182_s25, 0 }
 0x315   : > { %p3194_p2 = scmp.ge.s32.totalorder %s2436_s21, 2  ;;  %s1900_s14 = scalar_lea.sflag [#allocation4], %s1899_s9 }
 0x317   : > { %p2134_p6 = pnand %p3194_p2, %p3193_p1 }
 0x319   : > { %p2135_p12 = pneg %p2134_p6 }
 0x31b   : > { %2419 = dma.done.wait (%p2135_p12), %s1900_s14, 16384  }
 0x31c   : > { %2421 = vsyncadd (%p2135_p12), %s1900_s14, 4294950912  ;;  %p19_p7 = scmp.ge.s32.totalorder %s2551_s15, 4   ;;  %s3195_s18 = smov %s2428_s19 }
 0x31d   : > { %s3196_s19 = smov %s2432_s20  ;;  %s3197_s20 = smov %s2567_s27 }
 0x31e   : > { %s3198_s21 = smov %s2551_s15  ;;  %21 = sbr.rel (!%p19_p7) target bundleno = 6 (0x6), region = 93 }
 0x323   :  { %1905 = vsyncpa [#allocation3], 1 }
 0x324   :  { %1907 = vsyncpa [#allocation3 + $0x1], 1 }
 0x325   :  { %1908 = vsyncpa [#allocation6], 1 }
 0x326   :  { %1909 = vsyncpa [#allocation4], 1 }
 0x327   :  { %1911 = vsyncpa [#allocation4 + $0x1], 1 }

</bundles_post_ra>
